<compile_context>
chip_gen: v6e
topology: v6e:2x2x1
jax: 0.10.0
libtpu: 0.0.40
codegen_flags: <defaults>
</compile_context>

<pallas_src>
import functools
import math

import jax
import jax.numpy as jnp
import numpy as np
from jax.experimental import pallas as pl
from jax.experimental.pallas import tpu as pltpu


# ---------------------------------------------------------------------------
# Small static helpers (host side)
# ---------------------------------------------------------------------------
def _conv_out_len(l_pad, k, dil):
    # stride == 1 only
    return (l_pad - dil * (k - 1) - 1) + 1


def _upsample_pad_matrix(l_in, pad):
    """0/1 matrix G so that G @ x == zero_pad(nearest_upsample_x2(x), pad)."""
    l_up = 2 * l_in
    m = np.zeros((l_up + 2 * pad, l_in), np.float32)
    for p in range(pad, pad + l_up):
        m[p, (p - pad) // 2] = 1.0
    return m


def _pad_matrix(l_in, pad):
    """0/1 matrix P so that P @ x == zero_pad(x, pad)."""
    m = np.zeros((l_in + 2 * pad, l_in), np.float32)
    for p in range(pad, pad + l_in):
        m[p, p - pad] = 1.0
    return m


def _tap_gathers(g, l_out, K, dil, batch):
    """Per-tap gather matrices, block-diagonal over the stacked batch.

    Returns (K, batch*l_out, batch*l_in) with block k = I_B (x) g[k*dil:k*dil+l_out].
    Row (b*l_out + p) of block k picks padded/upsampled position (p + k*dil) of
    sample b (or a zero row inside the padding region)."""
    l_in = g.shape[1]
    out = np.zeros((K, batch * l_out, batch * l_in), np.float32)
    for k in range(K):
        gk = g[k * dil: k * dil + l_out, :]
        for b in range(batch):
            out[k, b * l_out:(b + 1) * l_out, b * l_in:(b + 1) * l_in] = gk
    return out


# ---------------------------------------------------------------------------
# Parameter init (PyTorch layout / PyTorch-like default inits)
# ---------------------------------------------------------------------------
def init_params(key, cfg, class_size):
    features, seq_len = cfg["input_shape"]
    latent_dim = cfg["latent_dim"]
    K = cfg["kernel_size"]
    init_size = math.ceil(seq_len / 4)
    keys = jax.random.split(key, 9)

    def unif(k, shape, fan_in):
        bound = 1.0 / math.sqrt(fan_in)
        return jax.random.uniform(k, shape, jnp.float32, -bound, bound)

    p = {
        "fc_w": unif(keys[0], (128 * init_size, latent_dim), latent_dim),
        "fc_b": unif(keys[1], (128 * init_size,), latent_dim),
        "emb": jax.random.normal(keys[2], (class_size, init_size), jnp.float32),
        "c1_w": unif(keys[3], (128, 128 + 1, K), (128 + 1) * K),
        "c1_b": unif(keys[4], (128,), (128 + 1) * K),
        "bn1_g": jnp.ones((128,), jnp.float32),
        "bn1_b": jnp.zeros((128,), jnp.float32),
        "c2_w": unif(keys[5], (64, 128, K), 128 * K),
        "c2_b": unif(keys[6], (64,), 128 * K),
        "bn2_g": jnp.ones((64,), jnp.float32),
        "bn2_b": jnp.zeros((64,), jnp.float32),
        "c3_w": unif(keys[7], (features, 64, K), 64 * K),
        "c3_b": unif(keys[8], (features,), 64 * K),
    }
    return p, init_size


# ---------------------------------------------------------------------------
# One-time layout transforms (hoisted off the forward / latency-critical path)
# ---------------------------------------------------------------------------
def prepare_params(p, cfg, init_size, batch_size):
    K, pad, dil = cfg["kernel_size"], cfg["padding"], cfg["dilation"]
    latent = cfg["latent_dim"]
    init = init_size
    B = batch_size

    fc_w = np.asarray(p["fc_w"], np.float32)      # (128*init, latent), out idx = c*init + l
    fc_b = np.asarray(p["fc_b"], np.float32)      # (128*init,)

    # fc restructured so that zb (B*init, init*latent) @ fc_stack directly yields
    # the batch-stacked (B*init, 128) slab: fc_stack[l*latent + j, c] = fc_w[c*init+l, j].
    fc_stack = (fc_w.reshape(128, init, latent).transpose(1, 2, 0)
                .reshape(init * latent, 128))
    fc_bias = np.tile(fc_b.reshape(128, init).T, (B, 1))          # (B*init, 128)

    g1 = _upsample_pad_matrix(init, pad)
    L1_out = _conv_out_len(2 * init + 2 * pad, K, dil)
    g2 = _upsample_pad_matrix(L1_out, pad)
    L2_out = _conv_out_len(2 * L1_out + 2 * pad, K, dil)
    g3 = _pad_matrix(L2_out, pad)

    c1_w = np.asarray(p["c1_w"], np.float32)      # (128, 129, K)
    c2_w = np.asarray(p["c2_w"], np.float32)      # (64, 128, K)
    c3_w = np.asarray(p["c3_w"], np.float32)      # (features, 64, K)

    def stack_taps(w):  # (C_out, C_in, K) -> (K*C_in, C_out), tap-major rows
        return np.concatenate([w[:, :, k].T for k in range(w.shape[2])], axis=0)

    # Per-class precomputed conv1 contribution of the 129th (embedding) channel:
    # emb_contrib[c, p, c_out] = sum_k up_pad(emb[c])[p + k*dil] * W1[c_out, 128, k]
    emb = np.asarray(p["emb"], np.float32)        # (class_size, init)
    w1e = c1_w[:, 128, :]                          # (128, K)
    up_emb = emb @ g1.T                            # (class_size, L1_pad)
    emb_contrib = np.zeros((emb.shape[0], L1_out, 128), np.float32)
    for k in range(K):
        emb_contrib += up_emb[:, k * dil: k * dil + L1_out, None] * w1e[None, None, :, k]

    prep = {
        "fc_w": fc_stack,                          # (init*latent, 128)
        "fc_b": fc_bias,                           # (B*init, 128)
        "emb_contrib": emb_contrib,                # (class_size, L1_out, 128)
        "g1k": _tap_gathers(g1, L1_out, K, dil, B),                    # (K, B*L1, B*init)
        "w1": stack_taps(c1_w[:, :128, :]),                            # (K*128, 128)
        "b1": np.asarray(p["c1_b"], np.float32).reshape(1, -1),
        "bn1_g": np.asarray(p["bn1_g"], np.float32).reshape(1, -1),
        "bn1_b": np.asarray(p["bn1_b"], np.float32).reshape(1, -1),
        "g2k": _tap_gathers(g2, L2_out, K, dil, B),                    # (K, B*L2, B*L1)
        "w2": stack_taps(c2_w),                                        # (K*128, 64)
        "b2": np.asarray(p["c2_b"], np.float32).reshape(1, -1),
        "bn2_g": np.asarray(p["bn2_g"], np.float32).reshape(1, -1),
        "bn2_b": np.asarray(p["bn2_b"], np.float32).reshape(1, -1),
        "g3k": _tap_gathers(g3, _conv_out_len(L2_out + 2 * pad, K, dil),
                            K, dil, B),                                # (K, B*L3, B*L2)
        "w3": stack_taps(c3_w),                                        # (K*64, features)
        "b3": np.asarray(p["c3_b"], np.float32).reshape(1, -1),
    }
    return {k: jnp.asarray(v) for k, v in prep.items()}


# ---------------------------------------------------------------------------
# The single fused kernel (whole forward, batch stacked on sublanes)
# ---------------------------------------------------------------------------
def _make_fused_kernel(*, B, K, slope, activ, eps=1e-5):
    def leaky(v):
        # slope in (0,1) => max(v, slope*v) == LeakyReLU(slope)(v); one VPU op.
        return jnp.maximum(v, slope * v)

    def kernel(label_ref, zb_ref, fcw_ref, fcb_ref, embc_ref,
               g1_ref, w1_ref, b1_ref, gm1_ref, bt1_ref,
               g2_ref, w2_ref, b2_ref, gm2_ref, bt2_ref,
               g3_ref, w3_ref, b3_ref, o_ref):
        f32 = jnp.float32
        dot = functools.partial(jnp.dot, preferred_element_type=f32)

        def conv(x, gk_ref, w_ref, b_ref):
            # im2col via 0/1 gather matmuls (upsample + pad + tap shift folded in),
            # lane-concat, then ONE deep matmul with tap-stacked weights.
            x_col = jnp.concatenate([dot(gk_ref[k], x) for k in range(K)], axis=1)
            return dot(x_col, w_ref[...]) + b_ref[...]

        def batchnorm_leaky(y, gamma_ref, beta_ref):
            n = float(y.shape[0])
            mean = jnp.sum(y, axis=0, keepdims=True) / n
            var = jnp.sum((y - mean) ** 2, axis=0, keepdims=True) / n
            sc = jax.lax.rsqrt(var + eps) * gamma_ref[...]
            return leaky(y * sc + (beta_ref[...] - mean * sc))

        # ---- fc: block-diagonal lhs -> rows already (batch, position)-stacked
        x1 = dot(zb_ref[...], fcw_ref[...]) + fcb_ref[...]          # (B*init, 128)

        # ---- conv1 (+ precomputed label-embedding channel contribution)
        y1 = conv(x1, g1_ref, w1_ref, b1_ref)                       # (B*L1, 128)
        y1 = y1 + jnp.concatenate(
            [embc_ref[label_ref[b]] for b in range(B)], axis=0)
        h1 = batchnorm_leaky(y1, gm1_ref, bt1_ref)

        # ---- conv2
        y2 = conv(h1, g2_ref, w2_ref, b2_ref)                       # (B*L2, 64)
        h2 = batchnorm_leaky(y2, gm2_ref, bt2_ref)

        # ---- conv3 + final activation
        y3 = conv(h2, g3_ref, w3_ref, b3_ref)                       # (B*L3, feat)
        if activ == "tanh":
            y3 = jnp.tanh(y3)
        elif activ == "relu":
            y3 = jnp.maximum(y3, 0.0)
        elif activ == "leakyrelu":
            y3 = jnp.maximum(y3, 0.01 * y3)   # nn.LeakyReLU() default slope
        # TODO(synk): activ_fct == 'linear:' (extra nn.Linear) not implemented.
        o_ref[...] = y3

    return kernel


# ---------------------------------------------------------------------------
# Forward wrapper: ONE pallas_call, whole-array VMEM blocks, label in SMEM
# ---------------------------------------------------------------------------
def cgenerator_forward(z, label, prep, cfg, init_size):
    B = z.shape[0]
    features, _ = cfg["input_shape"]
    K, pad, dil, stride = (cfg["kernel_size"], cfg["padding"],
                           cfg["dilation"], cfg["stride"])
    latent = cfg["latent_dim"]
    assert stride == 1  # TODO(synk): strided conv not implemented.
    if cfg["normalization"] != "batch":
        # TODO(synk): spectral_norm path not implemented.
        raise NotImplementedError("only normalization='batch' is supported")

    init = init_size
    L1_out = _conv_out_len(2 * init + 2 * pad, K, dil)
    L2_out = _conv_out_len(2 * L1_out + 2 * pad, K, dil)
    L3_out = _conv_out_len(L2_out + 2 * pad, K, dil)

    # Block-diagonal latent lhs: zb[b*init + l, l*latent + j] = z[b, j]
    # (tiny XLA op; lets the in-kernel fc matmul emit (B*init, 128) directly).
    eye = jnp.eye(init, dtype=z.dtype)
    zb = (z[:, None, None, :] * eye[None, :, :, None]).reshape(B * init, init * latent)

    label_i = jnp.reshape(label, (B,)).astype(jnp.int32)

    kernel = _make_fused_kernel(B=B, K=K, slope=0.2, activ=cfg["activ_fct"])

    args = (label_i, zb, prep["fc_w"], prep["fc_b"], prep["emb_contrib"],
            prep["g1k"], prep["w1"], prep["b1"], prep["bn1_g"], prep["bn1_b"],
            prep["g2k"], prep["w2"], prep["b2"], prep["bn2_g"], prep["bn2_b"],
            prep["g3k"], prep["w3"], prep["b3"])

    flops = 2 * (
        (B * init) * (init * latent) * 128
        + K * (B * L1_out) * (B * init) * 128 + (B * L1_out) * (K * 128) * 128
        + K * (B * L2_out) * (B * L1_out) * 128 + (B * L2_out) * (K * 128) * 64
        + K * (B * L3_out) * (B * L2_out) * 64 + (B * L3_out) * (K * 64) * features)
    bytes_accessed = (sum(int(np.prod(a.shape)) * a.dtype.itemsize for a in args)
                      + B * L3_out * features * 4)
    cost = pl.CostEstimate(flops=int(flops),
                           transcendentals=int(B * L3_out * features + 128 + 64),
                           bytes_accessed=int(bytes_accessed))

    vmem = pl.BlockSpec(memory_space=pltpu.MemorySpace.VMEM)
    smem = pl.BlockSpec(memory_space=pltpu.MemorySpace.SMEM)

    out_flat = pl.pallas_call(
        kernel,
        out_shape=jax.ShapeDtypeStruct((B * L3_out, features), jnp.float32),
        in_specs=[smem] + [vmem] * 17,
        out_specs=vmem,
        cost_estimate=cost,
    )(*args)

    # Tiny layout fixup in the wrapper (fuses into surrounding XLA for free).
    return out_flat.reshape(B, L3_out, features).transpose(0, 2, 1)


# ---------------------------------------------------------------------------
# Pure-JAX reference (mirrors the PyTorch forward) for the correctness check
# ---------------------------------------------------------------------------
def ref_forward(z, label, p, cfg, init_size):
    B = z.shape[0]
    stride, padding, dilation = cfg["stride"], cfg["padding"], cfg["dilation"]

    def conv(x, w, b):
        y = jax.lax.conv_general_dilated(
            x, w, window_strides=(stride,), padding=[(padding, padding)],
            rhs_dilation=(dilation,), dimension_numbers=("NCH", "OIH", "NCH"),
            precision=jax.lax.Precision.HIGHEST)
        return y + b[None, :, None]

    def bn(x, g, bb, eps=1e-5):
        m = x.mean(axis=(0, 2), keepdims=True)
        v = ((x - m) ** 2).mean(axis=(0, 2), keepdims=True)
        return (x - m) / jnp.sqrt(v + eps) * g[None, :, None] + bb[None, :, None]

    def leaky(x):
        return jnp.where(x > 0, x, 0.2 * x)

    out = z @ p["fc_w"].T + p["fc_b"]
    out = out.reshape(B, 128, init_size)
    emb = p["emb"][label[:, 0]]
    out = jnp.concatenate([out, emb[:, None, :]], axis=1)

    x = jnp.repeat(out, 2, axis=-1)
    x = leaky(bn(conv(x, p["c1_w"], p["c1_b"]), p["bn1_g"], p["bn1_b"]))
    x = jnp.repeat(x, 2, axis=-1)
    x = leaky(bn(conv(x, p["c2_w"], p["c2_b"]), p["bn2_g"], p["bn2_b"]))
    x = conv(x, p["c3_w"], p["c3_b"])
    return jnp.tanh(x)


if __name__ == "__main__":
    cfg = {
        "input_shape": (4, 16),   # (features, seq_len)
        "latent_dim": 8,
        "activ_fct": "tanh",
        "normalization": "batch",
        "stride": 1,
        "padding": 1,
        "kernel_size": 3,
        "dilation": 1,
    }
    class_size = 2
    B = 2

    key = jax.random.PRNGKey(0)
    kp, kz = jax.random.split(key)
    params, init_size = init_params(kp, cfg, class_size)
    prep = prepare_params(params, cfg, init_size, B)   # one-time layout transforms

    z = jax.random.normal(kz, (B, cfg["latent_dim"]), jnp.float32)
    label = jnp.array([[0], [1]], dtype=jnp.int32)     # (B, 1), as in PyTorch

    fwd = jax.jit(functools.partial(cgenerator_forward, cfg=cfg,
                                    init_size=init_size))
    out = jax.block_until_ready(fwd(z, label, prep))

    ref = ref_forward(z, label, params, cfg, init_size)
    assert out.shape == (B, cfg["input_shape"][0], cfg["input_shape"][1])
    np.testing.assert_allclose(np.asarray(out), np.asarray(ref),
                               rtol=2e-3, atol=2e-3)
    print("KERNEL_OK")
</pallas_src>

<mosaic_0001>
module attributes {stable_mosaic.version = 11 : i64} {
  func.func @kernel(%arg0: memref<2xi32, #tpu.memory_space<smem>>, %arg1: memref<8x32xf32, #tpu.memory_space<vmem>>, %arg2: memref<32x128xf32, #tpu.memory_space<vmem>>, %arg3: memref<8x128xf32, #tpu.memory_space<vmem>>, %arg4: memref<2x8x128xf32, #tpu.memory_space<vmem>>, %arg5: memref<3x16x8xf32, #tpu.memory_space<vmem>>, %arg6: memref<384x128xf32, #tpu.memory_space<vmem>>, %arg7: memref<1x128xf32, #tpu.memory_space<vmem>>, %arg8: memref<1x128xf32, #tpu.memory_space<vmem>>, %arg9: memref<1x128xf32, #tpu.memory_space<vmem>>, %arg10: memref<3x32x16xf32, #tpu.memory_space<vmem>>, %arg11: memref<384x64xf32, #tpu.memory_space<vmem>>, %arg12: memref<1x64xf32, #tpu.memory_space<vmem>>, %arg13: memref<1x64xf32, #tpu.memory_space<vmem>>, %arg14: memref<1x64xf32, #tpu.memory_space<vmem>>, %arg15: memref<3x32x32xf32, #tpu.memory_space<vmem>>, %arg16: memref<192x4xf32, #tpu.memory_space<vmem>>, %arg17: memref<1x4xf32, #tpu.memory_space<vmem>>, %arg18: memref<32x4xf32, #tpu.memory_space<vmem>>) attributes {dimension_semantics = [], scalar_prefetch = 0 : i64, scratch_operands = 0 : i64, tpu.core_type = #tpu.core_type<tc>} {
    %c0 = arith.constant 0 : index
    %c0_0 = arith.constant 0 : index
    %0 = vector.load %arg1[%c0, %c0_0] : memref<8x32xf32, #tpu.memory_space<vmem>>, vector<8x32xf32>
    %c0_1 = arith.constant 0 : index
    %c0_2 = arith.constant 0 : index
    %1 = vector.load %arg2[%c0_1, %c0_2] : memref<32x128xf32, #tpu.memory_space<vmem>>, vector<32x128xf32>
    %cst = arith.constant dense<0.000000e+00> : vector<8x128xf32>
    %2 = tpu.matmul %0, %1, %cst {dimension_numbers = #tpu.dot_dimension_numbers<[1], [0], [0], [1], [0, 0, 1, 1], [], []>} : vector<8x32xf32>, vector<32x128xf32>, vector<8x128xf32> -> vector<8x128xf32>
    %c0_3 = arith.constant 0 : index
    %c0_4 = arith.constant 0 : index
    %3 = vector.load %arg3[%c0_3, %c0_4] : memref<8x128xf32, #tpu.memory_space<vmem>>, vector<8x128xf32>
    %4 = arith.addf %2, %3 : vector<8x128xf32>
    %c0_5 = arith.constant 0 : index
    %c0_6 = arith.constant 0 : index
    %c0_7 = arith.constant 0 : index
    %5 = vector.load %arg5[%c0_5, %c0_6, %c0_7] : memref<3x16x8xf32, #tpu.memory_space<vmem>>, vector<1x16x8xf32>
    %6 = vector.shape_cast %5 : vector<1x16x8xf32> to vector<16x8xf32>
    %cst_8 = arith.constant dense<0.000000e+00> : vector<16x128xf32>
    %7 = tpu.matmul %6, %4, %cst_8 {dimension_numbers = #tpu.dot_dimension_numbers<[1], [0], [0], [1], [0, 0, 1, 1], [], []>} : vector<16x8xf32>, vector<8x128xf32>, vector<16x128xf32> -> vector<16x128xf32>
    %c1 = arith.constant 1 : index
    %c0_9 = arith.constant 0 : index
    %c0_10 = arith.constant 0 : index
    %8 = vector.load %arg5[%c1, %c0_9, %c0_10] : memref<3x16x8xf32, #tpu.memory_space<vmem>>, vector<1x16x8xf32>
    %9 = vector.shape_cast %8 : vector<1x16x8xf32> to vector<16x8xf32>
    %cst_11 = arith.constant dense<0.000000e+00> : vector<16x128xf32>
    %10 = tpu.matmul %9, %4, %cst_11 {dimension_numbers = #tpu.dot_dimension_numbers<[1], [0], [0], [1], [0, 0, 1, 1], [], []>} : vector<16x8xf32>, vector<8x128xf32>, vector<16x128xf32> -> vector<16x128xf32>
    %c2 = arith.constant 2 : index
    %c0_12 = arith.constant 0 : index
    %c0_13 = arith.constant 0 : index
    %11 = vector.load %arg5[%c2, %c0_12, %c0_13] : memref<3x16x8xf32, #tpu.memory_space<vmem>>, vector<1x16x8xf32>
    %12 = vector.shape_cast %11 : vector<1x16x8xf32> to vector<16x8xf32>
    %cst_14 = arith.constant dense<0.000000e+00> : vector<16x128xf32>
    %13 = tpu.matmul %12, %4, %cst_14 {dimension_numbers = #tpu.dot_dimension_numbers<[1], [0], [0], [1], [0, 0, 1, 1], [], []>} : vector<16x8xf32>, vector<8x128xf32>, vector<16x128xf32> -> vector<16x128xf32>
    %14 = tpu.concatenate %7, %10, %13 in 1 : vector<16x128xf32>, vector<16x128xf32>, vector<16x128xf32> -> vector<16x384xf32>
    %c0_15 = arith.constant 0 : index
    %c0_16 = arith.constant 0 : index
    %15 = vector.load %arg6[%c0_15, %c0_16] : memref<384x128xf32, #tpu.memory_space<vmem>>, vector<384x128xf32>
    %cst_17 = arith.constant dense<0.000000e+00> : vector<16x128xf32>
    %16 = tpu.matmul %14, %15, %cst_17 {dimension_numbers = #tpu.dot_dimension_numbers<[1], [0], [0], [1], [0, 0, 1, 1], [], []>} : vector<16x384xf32>, vector<384x128xf32>, vector<16x128xf32> -> vector<16x128xf32>
    %c0_18 = arith.constant 0 : index
    %c0_19 = arith.constant 0 : index
    %17 = vector.load %arg7[%c0_18, %c0_19] : memref<1x128xf32, #tpu.memory_space<vmem>>, vector<1x128xf32>
    %18 = vector.broadcast %17 : vector<1x128xf32> to vector<16x128xf32>
    %19 = arith.addf %16, %18 : vector<16x128xf32>
    %c0_20 = arith.constant 0 : index
    %20 = memref.load %arg0[%c0_20] : memref<2xi32, #tpu.memory_space<smem>>
    %21 = arith.index_cast %20 : i32 to index
    %c0_21 = arith.constant 0 : index
    %c0_22 = arith.constant 0 : index
    %22 = vector.load %arg4[%21, %c0_21, %c0_22] : memref<2x8x128xf32, #tpu.memory_space<vmem>>, vector<1x8x128xf32>
    %23 = vector.shape_cast %22 : vector<1x8x128xf32> to vector<8x128xf32>
    %c1_23 = arith.constant 1 : index
    %24 = memref.load %arg0[%c1_23] : memref<2xi32, #tpu.memory_space<smem>>
    %25 = arith.index_cast %24 : i32 to index
    %c0_24 = arith.constant 0 : index
    %c0_25 = arith.constant 0 : index
    %26 = vector.load %arg4[%25, %c0_24, %c0_25] : memref<2x8x128xf32, #tpu.memory_space<vmem>>, vector<1x8x128xf32>
    %27 = vector.shape_cast %26 : vector<1x8x128xf32> to vector<8x128xf32>
    %28 = tpu.concatenate %23, %27 in 0 : vector<8x128xf32>, vector<8x128xf32> -> vector<16x128xf32>
    %29 = arith.addf %19, %28 : vector<16x128xf32>
    %cst_26 = arith.constant dense<0.000000e+00> : vector<128xf32>
    %30 = vector.multi_reduction <add>, %29, %cst_26 [0] : vector<16x128xf32> to vector<128xf32>
    %31 = vector.shape_cast %30 : vector<128xf32> to vector<1x128xf32>
    %cst_27 = arith.constant 1.600000e+01 : f32
    %32 = vector.broadcast %cst_27 : f32 to vector<1x128xf32>
    %33 = arith.divf %31, %32 : vector<1x128xf32>
    %34 = vector.broadcast %33 : vector<1x128xf32> to vector<16x128xf32>
    %35 = arith.subf %29, %34 : vector<16x128xf32>
    %36 = arith.mulf %35, %35 : vector<16x128xf32>
    %cst_28 = arith.constant dense<0.000000e+00> : vector<128xf32>
    %37 = vector.multi_reduction <add>, %36, %cst_28 [0] : vector<16x128xf32> to vector<128xf32>
    %38 = vector.shape_cast %37 : vector<128xf32> to vector<1x128xf32>
    %cst_29 = arith.constant 1.600000e+01 : f32
    %39 = vector.broadcast %cst_29 : f32 to vector<1x128xf32>
    %40 = arith.divf %38, %39 : vector<1x128xf32>
    %cst_30 = arith.constant 9.99999974E-6 : f32
    %41 = vector.broadcast %cst_30 : f32 to vector<1x128xf32>
    %42 = arith.addf %40, %41 : vector<1x128xf32>
    %43 = math.rsqrt %42 : vector<1x128xf32>
    %c0_31 = arith.constant 0 : index
    %c0_32 = arith.constant 0 : index
    %44 = vector.load %arg8[%c0_31, %c0_32] : memref<1x128xf32, #tpu.memory_space<vmem>>, vector<1x128xf32>
    %45 = arith.mulf %43, %44 : vector<1x128xf32>
    %46 = vector.broadcast %45 : vector<1x128xf32> to vector<16x128xf32>
    %47 = arith.mulf %29, %46 : vector<16x128xf32>
    %c0_33 = arith.constant 0 : index
    %c0_34 = arith.constant 0 : index
    %48 = vector.load %arg9[%c0_33, %c0_34] : memref<1x128xf32, #tpu.memory_space<vmem>>, vector<1x128xf32>
    %49 = arith.mulf %33, %45 : vector<1x128xf32>
    %50 = arith.subf %48, %49 : vector<1x128xf32>
    %51 = vector.broadcast %50 : vector<1x128xf32> to vector<16x128xf32>
    %52 = arith.addf %47, %51 : vector<16x128xf32>
    %cst_35 = arith.constant 2.000000e-01 : f32
    %53 = vector.broadcast %cst_35 : f32 to vector<16x128xf32>
    %54 = arith.mulf %53, %52 : vector<16x128xf32>
    %55 = arith.maximumf %52, %54 : vector<16x128xf32>
    %c0_36 = arith.constant 0 : index
    %c0_37 = arith.constant 0 : index
    %c0_38 = arith.constant 0 : index
    %56 = vector.load %arg10[%c0_36, %c0_37, %c0_38] : memref<3x32x16xf32, #tpu.memory_space<vmem>>, vector<1x32x16xf32>
    %57 = vector.shape_cast %56 : vector<1x32x16xf32> to vector<32x16xf32>
    %cst_39 = arith.constant dense<0.000000e+00> : vector<32x128xf32>
    %58 = tpu.matmul %57, %55, %cst_39 {dimension_numbers = #tpu.dot_dimension_numbers<[1], [0], [0], [1], [0, 0, 1, 1], [], []>} : vector<32x16xf32>, vector<16x128xf32>, vector<32x128xf32> -> vector<32x128xf32>
    %c1_40 = arith.constant 1 : index
    %c0_41 = arith.constant 0 : index
    %c0_42 = arith.constant 0 : index
    %59 = vector.load %arg10[%c1_40, %c0_41, %c0_42] : memref<3x32x16xf32, #tpu.memory_space<vmem>>, vector<1x32x16xf32>
    %60 = vector.shape_cast %59 : vector<1x32x16xf32> to vector<32x16xf32>
    %cst_43 = arith.constant dense<0.000000e+00> : vector<32x128xf32>
    %61 = tpu.matmul %60, %55, %cst_43 {dimension_numbers = #tpu.dot_dimension_numbers<[1], [0], [0], [1], [0, 0, 1, 1], [], []>} : vector<32x16xf32>, vector<16x128xf32>, vector<32x128xf32> -> vector<32x128xf32>
    %c2_44 = arith.constant 2 : index
    %c0_45 = arith.constant 0 : index
    %c0_46 = arith.constant 0 : index
    %62 = vector.load %arg10[%c2_44, %c0_45, %c0_46] : memref<3x32x16xf32, #tpu.memory_space<vmem>>, vector<1x32x16xf32>
    %63 = vector.shape_cast %62 : vector<1x32x16xf32> to vector<32x16xf32>
    %cst_47 = arith.constant dense<0.000000e+00> : vector<32x128xf32>
    %64 = tpu.matmul %63, %55, %cst_47 {dimension_numbers = #tpu.dot_dimension_numbers<[1], [0], [0], [1], [0, 0, 1, 1], [], []>} : vector<32x16xf32>, vector<16x128xf32>, vector<32x128xf32> -> vector<32x128xf32>
    %65 = tpu.concatenate %58, %61, %64 in 1 : vector<32x128xf32>, vector<32x128xf32>, vector<32x128xf32> -> vector<32x384xf32>
    %c0_48 = arith.constant 0 : index
    %c0_49 = arith.constant 0 : index
    %66 = vector.load %arg11[%c0_48, %c0_49] : memref<384x64xf32, #tpu.memory_space<vmem>>, vector<384x64xf32>
    %cst_50 = arith.constant dense<0.000000e+00> : vector<32x64xf32>
    %67 = tpu.matmul %65, %66, %cst_50 {dimension_numbers = #tpu.dot_dimension_numbers<[1], [0], [0], [1], [0, 0, 1, 1], [], []>} : vector<32x384xf32>, vector<384x64xf32>, vector<32x64xf32> -> vector<32x64xf32>
    %c0_51 = arith.constant 0 : index
    %c0_52 = arith.constant 0 : index
    %68 = vector.load %arg12[%c0_51, %c0_52] : memref<1x64xf32, #tpu.memory_space<vmem>>, vector<1x64xf32>
    %69 = vector.broadcast %68 : vector<1x64xf32> to vector<32x64xf32>
    %70 = arith.addf %67, %69 : vector<32x64xf32>
    %cst_53 = arith.constant dense<0.000000e+00> : vector<64xf32>
    %71 = vector.multi_reduction <add>, %70, %cst_53 [0] : vector<32x64xf32> to vector<64xf32>
    %72 = vector.shape_cast %71 : vector<64xf32> to vector<1x64xf32>
    %cst_54 = arith.constant 3.200000e+01 : f32
    %73 = vector.broadcast %cst_54 : f32 to vector<1x64xf32>
    %74 = arith.divf %72, %73 : vector<1x64xf32>
    %75 = vector.broadcast %74 : vector<1x64xf32> to vector<32x64xf32>
    %76 = arith.subf %70, %75 : vector<32x64xf32>
    %77 = arith.mulf %76, %76 : vector<32x64xf32>
    %cst_55 = arith.constant dense<0.000000e+00> : vector<64xf32>
    %78 = vector.multi_reduction <add>, %77, %cst_55 [0] : vector<32x64xf32> to vector<64xf32>
    %79 = vector.shape_cast %78 : vector<64xf32> to vector<1x64xf32>
    %cst_56 = arith.constant 3.200000e+01 : f32
    %80 = vector.broadcast %cst_56 : f32 to vector<1x64xf32>
    %81 = arith.divf %79, %80 : vector<1x64xf32>
    %cst_57 = arith.constant 9.99999974E-6 : f32
    %82 = vector.broadcast %cst_57 : f32 to vector<1x64xf32>
    %83 = arith.addf %81, %82 : vector<1x64xf32>
    %84 = math.rsqrt %83 : vector<1x64xf32>
    %c0_58 = arith.constant 0 : index
    %c0_59 = arith.constant 0 : index
    %85 = vector.load %arg13[%c0_58, %c0_59] : memref<1x64xf32, #tpu.memory_space<vmem>>, vector<1x64xf32>
    %86 = arith.mulf %84, %85 : vector<1x64xf32>
    %87 = vector.broadcast %86 : vector<1x64xf32> to vector<32x64xf32>
    %88 = arith.mulf %70, %87 : vector<32x64xf32>
    %c0_60 = arith.constant 0 : index
    %c0_61 = arith.constant 0 : index
    %89 = vector.load %arg14[%c0_60, %c0_61] : memref<1x64xf32, #tpu.memory_space<vmem>>, vector<1x64xf32>
    %90 = arith.mulf %74, %86 : vector<1x64xf32>
    %91 = arith.subf %89, %90 : vector<1x64xf32>
    %92 = vector.broadcast %91 : vector<1x64xf32> to vector<32x64xf32>
    %93 = arith.addf %88, %92 : vector<32x64xf32>
    %cst_62 = arith.constant 2.000000e-01 : f32
    %94 = vector.broadcast %cst_62 : f32 to vector<32x64xf32>
    %95 = arith.mulf %94, %93 : vector<32x64xf32>
    %96 = arith.maximumf %93, %95 : vector<32x64xf32>
    %c0_63 = arith.constant 0 : index
    %c0_64 = arith.constant 0 : index
    %c0_65 = arith.constant 0 : index
    %97 = vector.load %arg15[%c0_63, %c0_64, %c0_65] : memref<3x32x32xf32, #tpu.memory_space<vmem>>, vector<1x32x32xf32>
    %98 = vector.shape_cast %97 : vector<1x32x32xf32> to vector<32x32xf32>
    %cst_66 = arith.constant dense<0.000000e+00> : vector<32x64xf32>
    %99 = tpu.matmul %98, %96, %cst_66 {dimension_numbers = #tpu.dot_dimension_numbers<[1], [0], [0], [1], [0, 0, 1, 1], [], []>} : vector<32x32xf32>, vector<32x64xf32>, vector<32x64xf32> -> vector<32x64xf32>
    %c1_67 = arith.constant 1 : index
    %c0_68 = arith.constant 0 : index
    %c0_69 = arith.constant 0 : index
    %100 = vector.load %arg15[%c1_67, %c0_68, %c0_69] : memref<3x32x32xf32, #tpu.memory_space<vmem>>, vector<1x32x32xf32>
    %101 = vector.shape_cast %100 : vector<1x32x32xf32> to vector<32x32xf32>
    %cst_70 = arith.constant dense<0.000000e+00> : vector<32x64xf32>
    %102 = tpu.matmul %101, %96, %cst_70 {dimension_numbers = #tpu.dot_dimension_numbers<[1], [0], [0], [1], [0, 0, 1, 1], [], []>} : vector<32x32xf32>, vector<32x64xf32>, vector<32x64xf32> -> vector<32x64xf32>
    %c2_71 = arith.constant 2 : index
    %c0_72 = arith.constant 0 : index
    %c0_73 = arith.constant 0 : index
    %103 = vector.load %arg15[%c2_71, %c0_72, %c0_73] : memref<3x32x32xf32, #tpu.memory_space<vmem>>, vector<1x32x32xf32>
    %104 = vector.shape_cast %103 : vector<1x32x32xf32> to vector<32x32xf32>
    %cst_74 = arith.constant dense<0.000000e+00> : vector<32x64xf32>
    %105 = tpu.matmul %104, %96, %cst_74 {dimension_numbers = #tpu.dot_dimension_numbers<[1], [0], [0], [1], [0, 0, 1, 1], [], []>} : vector<32x32xf32>, vector<32x64xf32>, vector<32x64xf32> -> vector<32x64xf32>
    %106 = tpu.concatenate %99, %102, %105 in 1 : vector<32x64xf32>, vector<32x64xf32>, vector<32x64xf32> -> vector<32x192xf32>
    %c0_75 = arith.constant 0 : index
    %c0_76 = arith.constant 0 : index
    %107 = vector.load %arg16[%c0_75, %c0_76] : memref<192x4xf32, #tpu.memory_space<vmem>>, vector<192x4xf32>
    %cst_77 = arith.constant dense<0.000000e+00> : vector<32x4xf32>
    %108 = tpu.matmul %106, %107, %cst_77 {dimension_numbers = #tpu.dot_dimension_numbers<[1], [0], [0], [1], [0, 0, 1, 1], [], []>} : vector<32x192xf32>, vector<192x4xf32>, vector<32x4xf32> -> vector<32x4xf32>
    %c0_78 = arith.constant 0 : index
    %c0_79 = arith.constant 0 : index
    %109 = vector.load %arg17[%c0_78, %c0_79] : memref<1x4xf32, #tpu.memory_space<vmem>>, vector<1x4xf32>
    %110 = vector.broadcast %109 : vector<1x4xf32> to vector<32x4xf32>
    %111 = arith.addf %108, %110 : vector<32x4xf32>
    %112 = math.tanh %111 : vector<32x4xf32>
    %c0_80 = arith.constant 0 : index
    %c0_81 = arith.constant 0 : index
    %113 = vector.load %arg18[%c0_80, %c0_81] : memref<32x4xf32, #tpu.memory_space<vmem>>, vector<32x4xf32>
    tpu.vector_store %arg18[%c0_80, %c0_81], %112 {strides = array<i32>} : memref<32x4xf32, #tpu.memory_space<vmem>>, vector<32x4xf32>,
    return
  }
}

</mosaic_0001>

<bundles_post_ra>
// kernel: cgenerator_forward.1
= control target key start
LH: loop header
LB: loop body
LE: loop exit
PB: predicated region body
PF: predicated region fallthrough
CT: control target
= control target key end

     0   :  { %s2867_s0 = inlined_call_operand.vmem [shape: s32[2], index: 0, kind: input, shape index: {}]   ;;  %s2868_s1 = inlined_call_operand.vmem [shape: f32[8,32], index: 1, kind: input, shape index: {}]   ;;  %s2869_s2 = inlined_call_operand.vmem [shape: f32[32,128], index: 2, kind: input, shape index: {}]   ;;  %s2870_s3 = inlined_call_operand.vmem [shape: f32[8,128], index: 3, kind: input, shape index: {}]   ;;  %s2871_s4 = inlined_call_operand.vmem [shape: f32[2,8,128], index: 4, kind: input, shape index: {}]   ;;  %s2872_s5 = inlined_call_operand.vmem [shape: f32[3,16,8], index: 5, kind: input, shape index: {}]   ;;  %s2873_s6 = inlined_call_operand.vmem [shape: f32[384,128], index: 6, kind: input, shape index: {}]   ;;  %s2874_s7 = inlined_call_operand.vmem [shape: f32[1,128], index: 7, kind: input, shape index: {}]   ;;  %s2875_s8 = inlined_call_operand.vmem [shape: f32[1,128], index: 8, kind: input, shape index: {}]   ;;  %s2876_s9 = inlined_call_operand.vmem [shape: f32[1,128], index: 9, kind: input, shape index: {}]   ;;  %s2877_s10 = inlined_call_operand.vmem [shape: f32[3,32,16], index: 10, kind: input, shape index: {}]   ;;  %s2878_s11 = inlined_call_operand.vmem [shape: f32[384,64], index: 11, kind: input, shape index: {}]   ;;  %s2879_s12 = inlined_call_operand.vmem [shape: f32[1,64], index: 12, kind: input, shape index: {}]   ;;  %s2880_s13 = inlined_call_operand.vmem [shape: f32[1,64], index: 13, kind: input, shape index: {}]   ;;  %s2881_s14 = inlined_call_operand.vmem [shape: f32[1,64], index: 14, kind: input, shape index: {}]   ;;  %s2882_s15 = inlined_call_operand.vmem [shape: f32[3,32,32], index: 15, kind: input, shape index: {}]   ;;  %s2883_s16 = inlined_call_operand.vmem [shape: f32[192,4], index: 16, kind: input, shape index: {}]   ;;  %s2884_s17 = inlined_call_operand.vmem [shape: f32[1,4], index: 17, kind: input, shape index: {}]   ;;  %s2885_s18 = inlined_call_operand.vmem [shape: f32[32,4], index: 18, kind: output, shape index: {}]  }
   0x1   :  { %2887 = sst [smem:[#allocation5_spill]] %s2867_s0 }
   0x2   :  { %2888 = sst [smem:[#allocation6_spill]] %s2868_s1 }
   0x3   :  { %2889 = sst [smem:[#allocation7_spill]] %s2869_s2 }
   0x4   :  { %23 = vsyncpa [#allocation3], 0  ;;  %s2890_s29 = sld [smem:[#allocation5_spill]] }
   0xa   :  { %s30_s30 = sshll.u32 %s2890_s29, 4  ;;  %s31_s30 = int_to_ptr.vmem [resolvable:$true] %s30_s30 }
   0xb   :  { %s2162_s0 = scalar_lea.vmem %s31_s30, 16  ;;  %p2167_p1 = scmp.lt.s32.totalorder %s31_s30, %s31_s30 }
   0xc   :  { %p2163_p0 = scmp.ne.s32.totalorder %s31_s30, %s2162_s0  ;;  %p2168_p2 = scmp.lt.s32.totalorder %s2162_s0, %s2162_s0 }
   0xe   :  { %p2169_p3 = por %p2168_p2, %p2167_p1 }
  0x10   :  { %p2170_p4 = pnand %p2169_p3, %p2163_p0 }
  0x12   :  { %2173 = shalt.err (!%p2170_p4)
}
  0x13   :  { %s2176_s19 = smov [#allocation2]  }
  0x14   :  { %33 = dma.vmem_to_smem %s31_s30, 16, %s2176_s19, [#allocation3]  }
  0x15   :  { %2174 = dma.done.wait [#allocation3], 16  }
  0x16   :  { %2175 = vsyncadd [#allocation3], 4294967280 }
  0x17   :  { %71 = sfence }
  0x18   :  { %s2891_s21 = sld [smem:[#allocation7_spill]]  ;;  %v2177_v1 = vmov 0.0   ;;  %vm2178_vm0 = vmmov 0   ;;  %vm78_vm1 = vcmask 261120   ;;  %v152_v6 = vld [vmem:[%s2872_s5] sm:$0xff]  ;;  %vm154_vm2 = vcmask 64512  }
  0x19   :  { %1975 = vmatprep.subr.mxu0 %v2177_v1  ;;  %1983 = vmatprep.mubr.msk.f32.mxu0 %vm2178_vm0, %v2177_v1  ;;  %s2892_s29 = sld [smem:[#allocation6_spill]]  ;;  %v77_v7 = vld [vmem:[%s2870_s3] sm:$0xff]  ;;  %v153_v11 = vld [vmem:[%s2872_s5 + $0x8] sm:$0xff]  ;;  %v1741_v12 = vld [vmem:[%s2872_s5 + $0x10] sm:$0xff]  ;;  %vm669_vm3 = vcmask 130048   ;;  %vm1196_vm4 = vcmask 523264  }
  0x1a   :  { %1988 = vmatprep.mubr.msk.f32.mxu1 %vm154_vm2, %v152_v6  ;;  %v1742_v13 = vld [vmem:[%s2872_s5 + $0x18] sm:$0xff]  ;;  %v1745_v14 = vld [vmem:[%s2872_s5 + $0x20] sm:$0xff]  ;;  %v1746_v16 = vld [vmem:[%s2872_s5 + $0x28] sm:$0xff]  ;;  %s609_s26 = sld [smem:[#allocation2]]  ;;  %vm1724_vm5 = vcmask 31744  }
  0x1b   :  { %v435_v15 = vld [vmem:[%s2873_s6 + $0xf8] sm:$0xff]  ;;  %v434_v18 = vld [vmem:[%s2873_s6 + $0xf0] sm:$0xff]  ;;  %v433_v20 = vld [vmem:[%s2873_s6 + $0xe8] sm:$0xff] }
  0x1c   :  { %v419_v17 = vld [vmem:[%s2873_s6 + $0x78] sm:$0xff]  ;;  %v418_v19 = vld [vmem:[%s2873_s6 + $0x70] sm:$0xff]  ;;  %v417_v21 = vld [vmem:[%s2873_s6 + $0x68] sm:$0xff] }
  0x1d   :  { %v432_v22 = vld [vmem:[%s2873_s6 + $0xe0] sm:$0xff]  ;;  %v431_v24 = vld [vmem:[%s2873_s6 + $0xd8] sm:$0xff]  ;;  %v430_v26 = vld [vmem:[%s2873_s6 + $0xd0] sm:$0xff] }
  0x1e   :  { %v76_v0 = vld [vmem:[%s2891_s21 + $0x18] sm:$0xff]  ;;  %v75_v2 = vld [vmem:[%s2891_s21 + $0x10] sm:$0xff]  ;;  %v74_v3 = vld [vmem:[%s2891_s21 + $0x8] sm:$0xff] }
  0x1f   :  { %1976 = vmatpush3.msra.mxu0 %v76_v0  ;;  %v73_v4 = vld [vmem:[%s2891_s21] sm:$0xff]  ;;  %v415_v25 = vld [vmem:[%s2873_s6 + $0x58] sm:$0xff]  ;;  %v414_v27 = vld [vmem:[%s2873_s6 + $0x50] sm:$0xff] }
  0x20   :  { %1977 = vmatprep.subr.mxu0 %v2177_v1  ;;  %v72_v5 = vld [vmem:[%s2892_s29] sm:$0xff]  ;;  %v429_v28 = vld [vmem:[%s2873_s6 + $0xc8] sm:$0xff]  ;;  %v427_v32 = vld [vmem:[%s2873_s6 + $0xb8] sm:$0xff]  ;;  %s1750_s28 = sshll.u32 %s609_s26, 3 }
  0x21   :  { %1978 = vmatpush3.msra.mxu0 %v75_v2  ;;  %v416_v23 = vld [vmem:[%s2873_s6 + $0x60] sm:$0xff]  ;;  %v413_v29 = vld [vmem:[%s2873_s6 + $0x48] sm:$0xff]  ;;  %v411_v33 = vld [vmem:[%s2873_s6 + $0x38] sm:$0xff]  ;;  %s611_s22 = scalar_lea.vmem %s2871_s4, %s1750_s28 }
  0x22   :  { %1979 = vmatprep.subr.mxu0 %v2177_v1  ;;  %v428_v30 = vld [vmem:[%s2873_s6 + $0xc0] sm:$0xff]  ;;  %v426_v34 = vld [vmem:[%s2873_s6 + $0xb0] sm:$0xff]  ;;  %v425_v36 = vld [vmem:[%s2873_s6 + $0xa8] sm:$0xff] }
  0x23   :  { %1980 = vmatpush3.msra.mxu0 %v74_v3  ;;  %v412_v31 = vld [vmem:[%s2873_s6 + $0x40] sm:$0xff]  ;;  %v410_v35 = vld [vmem:[%s2873_s6 + $0x30] sm:$0xff]  ;;  %v409_v37 = vld [vmem:[%s2873_s6 + $0x28] sm:$0xff] }
  0x24   :  { %1981 = vmatprep.subr.mxu0 %v2177_v1  ;;  %v424_v38 = vld [vmem:[%s2873_s6 + $0xa0] sm:$0xff]  ;;  %v423_v40 = vld [vmem:[%s2873_s6 + $0x98] sm:$0xff]  ;;  %v422_v42 = vld [vmem:[%s2873_s6 + $0x90] sm:$0xff] }
  0x25   :  { %1982 = vmatpush3.msra.mxu0 %v73_v4  ;;  %v408_v39 = vld [vmem:[%s2873_s6 + $0x20] sm:$0xff]  ;;  %v407_v41 = vld [vmem:[%s2873_s6 + $0x18] sm:$0xff]  ;;  %v406_v43 = vld [vmem:[%s2873_s6 + $0x10] sm:$0xff] }
  0x26   :  { %1984 = vmatmul.mubr.msk.f32.vlgmr.msra.gmra.mxu0 %vm78_vm1, %v72_v5  ;;  %v421_v44 = vld [vmem:[%s2873_s6 + $0x88] sm:$0xff]  ;;  %v420_v46 = vld [vmem:[%s2873_s6 + $0x80] sm:$0xff]  ;;  %v451_v48 = vld [vmem:[%s2873_s6 + $0x178] sm:$0xff] }
  0x27   :  { %v405_v45 = vld [vmem:[%s2873_s6 + $0x8] sm:$0xff]  ;;  %v404_v47 = vld [vmem:[%s2873_s6] sm:$0xff]  ;;  %v450_v53 = vld [vmem:[%s2873_s6 + $0x170] sm:$0xff] }
  0x28   :  { %v449_v55 = vld [vmem:[%s2873_s6 + $0x168] sm:$0xff]  ;;  %v448_v57 = vld [vmem:[%s2873_s6 + $0x160] sm:$0xff]  ;;  %v447_v58 = vld [vmem:[%s2873_s6 + $0x158] sm:$0xff] }
  0x29   :  { %v446_v59 = vld [vmem:[%s2873_s6 + $0x150] sm:$0xff]  ;;  %v445_v60 = vld [vmem:[%s2873_s6 + $0x148] sm:$0xff]  ;;  %v444_v61 = vld [vmem:[%s2873_s6 + $0x140] sm:$0xff] }
  0x2a   :  { %v443_v62 = vld [vmem:[%s2873_s6 + $0x138] sm:$0xff]  ;;  %v442_v63 = vld [vmem:[%s2873_s6 + $0x130] sm:$0xff]  ;;  %v441_v0 = vld [vmem:[%s2873_s6 + $0x128] sm:$0xff] }
  0x2b   :  { %v440_v2 = vld [vmem:[%s2873_s6 + $0x120] sm:$0xff]  ;;  %v439_v3 = vld [vmem:[%s2873_s6 + $0x118] sm:$0xff]  ;;  %v438_v4 = vld [vmem:[%s2873_s6 + $0x110] sm:$0xff] }
  0x2c   :  { %v437_v5 = vld [vmem:[%s2873_s6 + $0x108] sm:$0xff]  ;;  %v436_v6 = vld [vmem:[%s2873_s6 + $0x100] sm:$0xff]  ;;  %s1751_s6 = sld [smem:[#allocation2 + $0x1]] }
  0x32   :  { %s1752_s27 = sshll.u32 %s1751_s6, 3 }
  0x33   :  { %s615_s1 = scalar_lea.vmem %s2871_s4, %s1752_s27 }
  0xe6   :  { %v148_v8 = vpop.f32.mrf.mxu0 }
  0xe7   :  { %v149_v9 = vadd.f32 %v148_v8, %v77_v7  ;;  %v665_v7 = vld [vmem:[%s2877_s10] sm:$0xff] }
  0xe8   :  { %v1985_v10 = vpop.f32.mrf.mxu0  ;;  %2040 = vmatprep.mubr.msk.f32.mxu0 %vm669_vm3, %v665_v7  ;;  %v1765_v8 = vld [vmem:[%s2877_s10 + $0x40] sm:$0xff]  ;;  %v668_v7 = vld [vmem:[%s2877_s10 + $0x18] sm:$0xff] }
  0xe9   :  { %1986 = vmatprep.subr.mxu1 %v149_v9 }
  0xea   :  { %1987 = vmatpush3.msra.mxu1 %v149_v9 }
  0xeb   :  { %1989 = vmatmul.mubr.msk.f32.vlgmr.msra.gmra.mxu1 %vm154_vm2, %v153_v11  ;;  %1991 = vmatprep.subr.mxu1 %v149_v9 }
  0xec   :  { %1992 = vmatpush3.msra.mxu1 %v149_v9  ;;  %1993 = vmatprep.mubr.msk.f32.mxu1 %vm154_vm2, %v1741_v12 }
  0xed   :  { %1996 = vmatprep.subr.mxu1 %v149_v9 }
  0xef   :  { %1994 = vmatmul.mubr.msk.f32.vlgmr.msra.gmra.mxu1 %vm154_vm2, %v1742_v13 }
  0xf0   :  { %1997 = vmatpush3.msra.mxu1 %v149_v9  ;;  %1998 = vmatprep.mubr.msk.f32.mxu1 %vm154_vm2, %v1745_v14 }
  0xf1   :  { %1813 = vmatprep.subr.mxu1 %v435_v15  ;;  %v1749_v15 = vld [vmem:[%s2874_s7] ss:$0 sm:$0xff] }
  0xf3   :  { %1999 = vmatmul.mubr.msk.f32.vlgmr.msra.gmra.mxu1 %vm154_vm2, %v1746_v16 }
  0xf4   :  { %1814 = vmatpush3.msra.mxu1 %v419_v17 }
  0xf5   :  { %1815 = vmatprep.subr.mxu1 %v434_v18 }
  0xf6   :  { %1816 = vmatpush3.msra.mxu1 %v418_v19 }
  0xf7   :  { %1817 = vmatprep.subr.mxu1 %v433_v20  ;;  %v616_v20 = vld [vmem:[%s615_s1] sm:$0xff] }
  0xf8   :  { %1818 = vmatpush3.msra.mxu1 %v417_v21 }
  0xf9   :  { %1819 = vmatprep.subr.mxu1 %v432_v22  ;;  %v612_v22 = vld [vmem:[%s611_s22] sm:$0xff] }
  0xfa   :  { %1820 = vmatpush3.msra.mxu1 %v416_v23 }
  0xfb   :  { %1821 = vmatprep.subr.mxu1 %v431_v24 }
  0xfc   :  { %1822 = vmatpush3.msra.mxu1 %v415_v25 }
  0xfd   :  { %1823 = vmatprep.subr.mxu1 %v430_v26 }
  0xfe   :  { %1824 = vmatpush3.msra.mxu1 %v414_v27 }
  0xff   :  { %1825 = vmatprep.subr.mxu1 %v429_v28 }
 0x100   :  { %1826 = vmatpush3.msra.mxu1 %v413_v29 }
 0x101   :  { %1827 = vmatprep.subr.mxu1 %v428_v30 }
 0x102   :  { %1828 = vmatpush3.msra.mxu1 %v412_v31 }
 0x103   :  { %1829 = vmatprep.subr.mxu1 %v427_v32 }
 0x104   :  { %1830 = vmatpush3.msra.mxu1 %v411_v33 }
 0x105   :  { %1831 = vmatprep.subr.mxu1 %v426_v34 }
 0x106   :  { %1832 = vmatpush3.msra.mxu1 %v410_v35 }
 0x107   :  { %1833 = vmatprep.subr.mxu1 %v425_v36 }
 0x108   :  { %1834 = vmatpush3.msra.mxu1 %v409_v37 }
 0x109   :  { %1835 = vmatprep.subr.mxu1 %v424_v38 }
 0x10a   :  { %1836 = vmatpush3.msra.mxu1 %v408_v39 }
 0x10b   :  { %1837 = vmatprep.subr.mxu1 %v423_v40 }
 0x10c   :  { %1838 = vmatpush3.msra.mxu1 %v407_v41 }
 0x10d   :  { %1839 = vmatprep.subr.mxu1 %v422_v42 }
 0x10e   :  { %1840 = vmatpush3.msra.mxu1 %v406_v43 }
 0x10f   :  { %1841 = vmatprep.subr.mxu1 %v421_v44 }
 0x110   :  { %1842 = vmatpush3.msra.mxu1 %v405_v45 }
 0x111   :  { %1843 = vmatprep.subr.mxu1 %v420_v46 }
 0x112   :  { %1844 = vmatpush3.msra.mxu1 %v404_v47  ;;  %v644_v47 = vlaneseq }
 0x113   :  { %2001 = vmatprep.subr.mxu1 %v451_v48 }
 0x1ab   :  { %v1990_v49 = vpop.f32.mrf.mxu1 }
 0x1ad   :  { %v227_v50 = vpop.f32.mrf.mxu1 }
 0x1af   :  { %v1995_v51 = vpop.f32.mrf.mxu1 }
 0x1b1   :  { %v311_v52 = vpop.f32.mrf.mxu1 }
 0x1b2   :  { %523 = vmatprep.mubr.f32.mxu1 %v311_v52 }
 0x1b3   :  { %524 = vmatmul.mubr.f32.vlgmr.msra.gmra.mxu1 %v227_v50  ;;  %v2000_v54 = vpop.f32.mrf.mxu1 }
 0x1b4   :  { %2002 = vmatpush3.msra.mxu1 %v451_v48  ;;  %528 = vmatprep.mubr.f32.mxu1 %v1995_v51  ;;  %v645_v48 = vshrl.u32 %v644_v47, 7  ;;  %v990_v47 = vld [vmem:[%s2878_s11 + $0x98] sm:$0xff] }
 0x1b5   :  { %2003 = vmatprep.subr.mxu1 %v450_v53  ;;  %v395_v56 = vpop.f32.mrf.mxu1 }
 0x1b6   :  { %2004 = vmatpush3.msra.mxu1 %v450_v53  ;;  %v2490_v50 = vsub.s32 0, %v645_v48  ;;  %v650_v53 = vld [vmem:[%s2876_s9] sm:$0x1]  ;;  %v1008_v48 = vld [vmem:[%s2878_s11 + $0x128] sm:$0xff] }
 0x1b7   :  { %2005 = vmatprep.subr.mxu1 %v449_v55  ;;  %529 = vmatmul.mubr.f32.gmra.mxu1 %v1990_v49  ;;  %v642_v49 = vld [vmem:[%s2875_s8] sm:$0x1] }
 0x1b8   :  { %2006 = vmatpush3.msra.mxu1 %v449_v55  ;;  %2033 = vmatprep.mubr.f32.mxu1 %v395_v56 }
 0x1b9   :  { %2007 = vmatprep.subr.mxu1 %v448_v57 }
 0x1ba   :  { %2008 = vmatpush3.msra.mxu1 %v448_v57 }
 0x1bb   :  { %2009 = vmatprep.subr.mxu1 %v447_v58 }
 0x1bc   :  { %2010 = vmatpush3.msra.mxu1 %v447_v58 }
 0x1bd   :  { %2011 = vmatprep.subr.mxu1 %v446_v59 }
 0x1be   :  { %2012 = vmatpush3.msra.mxu1 %v446_v59 }
 0x1bf   :  { %2013 = vmatprep.subr.mxu1 %v445_v60 }
 0x1c0   :  { %2014 = vmatpush3.msra.mxu1 %v445_v60 }
 0x1c1   :  { %2015 = vmatprep.subr.mxu1 %v444_v61 }
 0x1c2   :  { %2016 = vmatpush3.msra.mxu1 %v444_v61 }
 0x1c3   :  { %2017 = vmatprep.subr.mxu1 %v443_v62 }
 0x1c4   :  { %2018 = vmatpush3.msra.mxu1 %v443_v62 }
 0x1c5   :  { %2019 = vmatprep.subr.mxu1 %v442_v63 }
 0x1c6   :  { %2020 = vmatpush3.msra.mxu1 %v442_v63 }
 0x1c7   :  { %2021 = vmatprep.subr.mxu1 %v441_v0 }
 0x1c8   :  { %2022 = vmatpush3.msra.mxu1 %v441_v0 }
 0x1c9   :  { %2023 = vmatprep.subr.mxu1 %v440_v2 }
 0x1ca   :  { %2024 = vmatpush3.msra.mxu1 %v440_v2 }
 0x1cb   :  { %2025 = vmatprep.subr.mxu1 %v439_v3 }
 0x1cc   :  { %2026 = vmatpush3.msra.mxu1 %v439_v3  ;;  %v666_v3 = vld [vmem:[%s2877_s10 + $0x8] sm:$0xff] }
 0x1cd   :  { %2027 = vmatprep.subr.mxu1 %v438_v4 }
 0x1ce   :  { %2028 = vmatpush3.msra.mxu1 %v438_v4  ;;  %v667_v4 = vld [vmem:[%s2877_s10 + $0x10] sm:$0xff] }
 0x1cf   :  { %2029 = vmatprep.subr.mxu1 %v437_v5 }
 0x1d0   :  { %2030 = vmatpush3.msra.mxu1 %v437_v5  ;;  %v1766_v5 = vld [vmem:[%s2877_s10 + $0x48] sm:$0xff] }
 0x1d1   :  { %2031 = vmatprep.subr.mxu1 %v436_v6 }
 0x1d2   :  { %2032 = vmatpush3.msra.mxu1 %v436_v6  ;;  %v1767_v6 = vld [vmem:[%s2877_s10 + $0x50] sm:$0xff] }
 0x1d3   :  { %2034 = vmatmul.mubr.f32.vlgmr.msra.gmra.mxu1 %v2000_v54 }
 0x1d4   :  { %2060 = vmatprep.mubr.msk.f32.mxu1 %vm669_vm3, %v1765_v8  ;;  %v1002_v8 = vld [vmem:[%s2878_s11 + $0xf8] sm:$0xff] }
 0x273   :  { %v1845_v9 = vpop.f32.mrf.mxu1 }
 0x275   :  { %v1846_v10 = vpop.f32.mrf.mxu1 }
 0x276   :  { %v1847_v14 = vadd.f32 %v1846_v10, %v1845_v9  ;;  %v1757_v9 = vld [vmem:[%s2877_s10 + $0x20] sm:$0xff]  ;;  %v1018_v10 = vld [vmem:[%s2878_s11 + $0x178] sm:$0xff] }
 0x277   :  { %v1848_v11 = vpop.f32.mrf.mxu1 }
 0x278   :  { %v526_v19 = vadd.f32 %v1847_v14, %v1749_v15  ;;  %v1759_v14 = vld [vmem:[%s2877_s10 + $0x30] sm:$0xff] }
 0x279   :  { %v1849_v12 = vpop.f32.mrf.mxu1 }
 0x27a   :  { %v1850_v13 = vadd.f32 %v1849_v12, %v1848_v11  ;;  %v1768_v11 = vld [vmem:[%s2877_s10 + $0x58] sm:$0xff]  ;;  %v1758_v12 = vld [vmem:[%s2877_s10 + $0x28] sm:$0xff] }
 0x27c   :  { %v531_v16 = vadd.f32 %v1850_v13, %v1749_v15  ;;  %v1017_v13 = vld [vmem:[%s2878_s11 + $0x170] sm:$0xff]  ;;  %v986_v15 = vld [vmem:[%s2878_s11 + $0x78] sm:$0xff] }
 0x293   :  { %v2035_v17 = vpop.f32.mrf.mxu1 }
 0x294   :  { %v606_v18 = vadd.f32 %v2035_v17, %v531_v16  ;;  %v1001_v16 = vld [vmem:[%s2878_s11 + $0xf0] sm:$0xff] }
 0x295   :  { %v600_v21 = vpop.f32.mrf.mxu1  ;;  %v985_v17 = vld [vmem:[%s2878_s11 + $0x70] sm:$0xff] }
 0x296   :  { %v601_v23 = vadd.f32 %v600_v21, %v526_v19  ;;  %v618_v24 = vadd.f32 %v616_v20, %v606_v18  ;;  %v1016_v18 = vld [vmem:[%s2878_s11 + $0x168] sm:$0xff]  ;;  %v1760_v19 = vld [vmem:[%s2877_s10 + $0x38] sm:$0xff]  ;;  %s2179_s10 = smov 64  }
 0x297   :  { %v1000_v20 = vld [vmem:[%s2878_s11 + $0xe8] sm:$0xff] }
 0x298   :  { %v617_v25 = vadd.f32 %v612_v22, %v601_v23  ;;  %v984_v21 = vld [vmem:[%s2878_s11 + $0x68] sm:$0xff]  ;;  %v999_v22 = vld [vmem:[%s2878_s11 + $0xe0] sm:$0xff] }
 0x299   :  { %v1015_v23 = vld [vmem:[%s2878_s11 + $0x160] sm:$0xff] }
 0x29a   :  { %v619_v26 = vadd.f32 %v618_v24, %v617_v25 }
 0x29c   :  { %v620_v27 = vrot.slane %v619_v26, 4 }
 0x29e   :  { %v621_v28 = vadd.f32 %v620_v27, %v619_v26  ;;  %v1014_v26 = vld [vmem:[%s2878_s11 + $0x158] sm:$0xff] }
 0x29f   :  { %v982_v27 = vld [vmem:[%s2878_s11 + $0x58] sm:$0xff] }
 0x2a0   :  { %v622_v29 = vrot.slane %v621_v28, 2 }
 0x2a2   :  { %v623_v30 = vadd.f32 %v622_v29, %v621_v28  ;;  %v997_v28 = vld [vmem:[%s2878_s11 + $0xd0] sm:$0xff] }
 0x2a3   :  { %v1013_v29 = vld [vmem:[%s2878_s11 + $0x150] sm:$0xff] }
 0x2a4   :  { %v624_v31 = vrot.slane %v623_v30, 1 }
 0x2a6   :  { %v625_v32 = vadd.f32 %v624_v31, %v623_v30  ;;  %v981_v30 = vld [vmem:[%s2878_s11 + $0x50] sm:$0xff]  ;;  %v996_v31 = vld [vmem:[%s2878_s11 + $0xc8] sm:$0xff] }
 0x2a8   :  { %v627_v33 = vmul.f32 0.0625, %v625_v32  ;;  %v1012_v32 = vld [vmem:[%s2878_s11 + $0x148] sm:$0xff] }
 0x2aa   :  { %v628_v34 = vsub.f32 %v617_v25, %v627_v33  ;;  %v629_v35 = vsub.f32 %v618_v24, %v627_v33 }
 0x2ac   :  { %v630_v36 = vmul.f32 %v628_v34, %v628_v34  ;;  %v631_v37 = vmul.f32 %v629_v35, %v629_v35  ;;  %v995_v34 = vld [vmem:[%s2878_s11 + $0xc0] sm:$0xff] }
 0x2ad   :  { %v1011_v35 = vld [vmem:[%s2878_s11 + $0x140] sm:$0xff] }
 0x2ae   :  { %v632_v38 = vadd.f32 %v631_v37, %v630_v36  ;;  %v979_v36 = vld [vmem:[%s2878_s11 + $0x40] sm:$0xff]  ;;  %v994_v37 = vld [vmem:[%s2878_s11 + $0xb8] sm:$0xff] }
 0x2b0   :  { %v633_v39 = vrot.slane %v632_v38, 4 }
 0x2b2   :  { %v634_v40 = vadd.f32 %v633_v39, %v632_v38  ;;  %v978_v38 = vld [vmem:[%s2878_s11 + $0x38] sm:$0xff]  ;;  %v993_v39 = vld [vmem:[%s2878_s11 + $0xb0] sm:$0xff] }
 0x2b4   :  { %v635_v41 = vrot.slane %v634_v40, 2 }
 0x2b6   :  { %v636_v42 = vadd.f32 %v635_v41, %v634_v40  ;;  %v977_v40 = vld [vmem:[%s2878_s11 + $0x30] sm:$0xff]  ;;  %v992_v41 = vld [vmem:[%s2878_s11 + $0xa8] sm:$0xff] }
 0x2b8   :  { %v637_v43 = vrot.slane %v636_v42, 1 }
 0x2ba   :  { %v638_v44 = vadd.f32 %v637_v43, %v636_v42  ;;  %v1010_v42 = vld [vmem:[%s2878_s11 + $0x138] sm:$0xff]  ;;  %v976_v43 = vld [vmem:[%s2878_s11 + $0x28] sm:$0xff] }
 0x2bc   :  { %v639_v45 = vmul.f32 0.0625, %v638_v44  ;;  %v991_v44 = vld [vmem:[%s2878_s11 + $0xa0] sm:$0xff] }
 0x2be   :  { %v640_v46 = vadd.f32 1e-05, %v639_v45  ;;  %v1009_v45 = vld [vmem:[%s2878_s11 + $0x130] sm:$0xff] }
 0x2c0   :  { %2150 = vrsqrt.f32 %v640_v46  ;;  %v975_v46 = vld [vmem:[%s2878_s11 + $0x20] sm:$0xff] }
 0x2cd   :  { %v2151_v51 = vpop.eup %2150 }
 0x2ce   :  { %v643_v52 = vmul.f32 %v2151_v51, %v642_v49  ;;  %v974_v49 = vld [vmem:[%s2878_s11 + $0x18] sm:$0xff]  ;;  %v989_v51 = vld [vmem:[%s2878_s11 + $0x90] sm:$0xff] }
 0x2d0   :  { %v647_v54 = vrot.slane %v643_v52, %v2490_v50  ;;  %v651_v55 = vmul.f32 %v643_v52, %v627_v33  ;;  %v980_v33 = vld [vmem:[%s2878_s11 + $0x48] sm:$0xff]  ;;  %v1007_v52 = vld [vmem:[%s2878_s11 + $0x120] sm:$0xff] }
 0x2d2   :  { %v652_v56 = vsub.f32 %v650_v53, %v651_v55  ;;  %v648_v57 = vmul.f32 %v647_v54, %v617_v25  ;;  %v649_v58 = vmul.f32 %v647_v54, %v618_v24  ;;  %v983_v24 = vld [vmem:[%s2878_s11 + $0x60] sm:$0xff]  ;;  %v998_v25 = vld [vmem:[%s2878_s11 + $0xd8] sm:$0xff]  ;;  %v973_v53 = vld [vmem:[%s2878_s11 + $0x10] sm:$0xff] }
 0x2d3   :  { %v988_v54 = vld [vmem:[%s2878_s11 + $0x88] sm:$0xff]  ;;  %v1006_v55 = vld [vmem:[%s2878_s11 + $0x118] sm:$0xff] }
 0x2d4   :  { %v657_v59 = vrot.slane %v652_v56, %v2490_v50  ;;  %v972_v56 = vld [vmem:[%s2878_s11 + $0x8] sm:$0xff] }
 0x2d6   :  { %v659_v60 = vadd.f32 %v657_v59, %v648_v57  ;;  %v660_v61 = vadd.f32 %v657_v59, %v649_v58  ;;  %v987_v57 = vld [vmem:[%s2878_s11 + $0x80] sm:$0xff]  ;;  %v1005_v58 = vld [vmem:[%s2878_s11 + $0x110] sm:$0xff] }
 0x2d7   :  { %v971_v59 = vld [vmem:[%s2878_s11] sm:$0xff] }
 0x2d8   :  { %v661_v62 = vmul.f32 0.2, %v659_v60  ;;  %v662_v63 = vmul.f32 0.2, %v660_v61 }
 0x2da   :  { %v664_v0 = vmax.f32 %v660_v61, %v662_v63  ;;  %v663_v2 = vmax.f32 %v659_v60, %v661_v62  ;;  %v1004_v60 = vld [vmem:[%s2878_s11 + $0x108] sm:$0xff]  ;;  %v1003_v61 = vld [vmem:[%s2878_s11 + $0x100] sm:$0xff] }
 0x2dc   :  { %2036 = vmatprep.subr.mxu0 %v664_v0  ;;  %2056 = vmatprep.subr.mxu1 %v664_v0 }
 0x2dd   :  { %2037 = vmatpush3.msra.mxu0 %v664_v0  ;;  %2057 = vmatpush3.msra.mxu1 %v664_v0 }
 0x2de   :  { %2038 = vmatprep.subr.mxu0 %v663_v2  ;;  %2058 = vmatprep.subr.mxu1 %v663_v2 }
 0x2df   :  { %2039 = vmatpush3.msra.mxu0 %v663_v2  ;;  %2059 = vmatpush3.msra.mxu1 %v663_v2 }
 0x2e0   :  { %2041 = vmatmul.mubr.msk.f32.vlgmr.msra.gmra.mxu0 %vm669_vm3, %v666_v3  ;;  %2046 = vmatprep.subr.mxu0 %v664_v0 }
 0x2e1   :  { %2047 = vmatpush3.msra.mxu0 %v664_v0  ;;  %2043 = vmatprep.mubr.msk.f32.mxu0 %vm669_vm3, %v667_v4 }
 0x2e2   :  { %2048 = vmatprep.subr.mxu0 %v663_v2  ;;  %2061 = vmatmul.mubr.msk.f32.vlgmr.msra.gmra.mxu1 %vm669_vm3, %v1766_v5 }
 0x2e3   :  { %2049 = vmatpush3.msra.mxu0 %v663_v2  ;;  %2063 = vmatprep.mubr.msk.f32.mxu1 %vm669_vm3, %v1767_v6 }
 0x2e4   :  { %2044 = vmatmul.mubr.msk.f32.gmra.mxu0 %vm669_vm3, %v668_v7  ;;  %1887 = vmatprep.subr.mxu0 %v1002_v8 }
 0x2e5   :  { %2050 = vmatprep.mubr.msk.f32.mxu0 %vm669_vm3, %v1757_v9  ;;  %2066 = vmatprep.subr.mxu1 %v1018_v10 }
 0x2e6   :  { %2064 = vmatmul.mubr.msk.f32.gmra.mxu1 %vm669_vm3, %v1768_v11  ;;  %v1778_v11 = vld [vmem:[%s2882_s15 + $0x20] sm:$0xff] }
 0x2e7   :  { %2067 = vmatpush3.msra.mxu1 %v1018_v10 }
 0x2e8   :  { %2051 = vmatmul.mubr.msk.f32.vlgmr.msra.gmra.mxu0 %vm669_vm3, %v1758_v12  ;;  %2068 = vmatprep.subr.mxu1 %v1017_v13  ;;  %v1267_v12 = vld [vmem:[%s2882_s15] sm:$0xff] }
 0x2e9   :  { %2053 = vmatprep.mubr.msk.f32.mxu0 %vm669_vm3, %v1759_v14  ;;  %1888 = vmatpush3.msra.mxu0 %v986_v15 }
 0x2ea   :  { %1889 = vmatprep.subr.mxu0 %v1001_v16  ;;  %2069 = vmatpush3.msra.mxu1 %v1017_v13 }
 0x2eb   :  { %1890 = vmatpush3.msra.mxu0 %v985_v17  ;;  %2070 = vmatprep.subr.mxu1 %v1016_v18 }
 0x2ec   :  { %2054 = vmatmul.mubr.msk.f32.gmra.mxu0 %vm669_vm3, %v1760_v19  ;;  %1891 = vmatprep.subr.mxu0 %v1000_v20 }
 0x2ed   :  { %1892 = vmatpush3.msra.mxu0 %v984_v21  ;;  %2071 = vmatpush3.msra.mxu1 %v1016_v18  ;;  %v1773_v18 = vld [vmem:[%s2879_s12] ss:$0 sm:$0xff] }
 0x2ee   :  { %1893 = vmatprep.subr.mxu0 %v999_v22  ;;  %2072 = vmatprep.subr.mxu1 %v1015_v23 }
 0x2ef   :  { %1894 = vmatpush3.msra.mxu0 %v983_v24  ;;  %2073 = vmatpush3.msra.mxu1 %v1015_v23 }
 0x2f0   :  { %1895 = vmatprep.subr.mxu0 %v998_v25  ;;  %2074 = vmatprep.subr.mxu1 %v1014_v26 }
 0x2f1   :  { %1896 = vmatpush3.msra.mxu0 %v982_v27  ;;  %2075 = vmatpush3.msra.mxu1 %v1014_v26 }
 0x2f2   :  { %1897 = vmatprep.subr.mxu0 %v997_v28  ;;  %2076 = vmatprep.subr.mxu1 %v1013_v29 }
 0x2f3   :  { %1898 = vmatpush3.msra.mxu0 %v981_v30  ;;  %2077 = vmatpush3.msra.mxu1 %v1013_v29 }
 0x2f4   :  { %1899 = vmatprep.subr.mxu0 %v996_v31  ;;  %2078 = vmatprep.subr.mxu1 %v1012_v32 }
 0x2f5   :  { %1900 = vmatpush3.msra.mxu0 %v980_v33  ;;  %2079 = vmatpush3.msra.mxu1 %v1012_v32 }
 0x2f6   :  { %1901 = vmatprep.subr.mxu0 %v995_v34  ;;  %2080 = vmatprep.subr.mxu1 %v1011_v35 }
 0x2f7   :  { %1902 = vmatpush3.msra.mxu0 %v979_v36  ;;  %2081 = vmatpush3.msra.mxu1 %v1011_v35 }
 0x2f8   :  { %1903 = vmatprep.subr.mxu0 %v994_v37  ;;  %2082 = vmatprep.subr.mxu1 %v1010_v42 }
 0x2f9   :  { %1904 = vmatpush3.msra.mxu0 %v978_v38  ;;  %2083 = vmatpush3.msra.mxu1 %v1010_v42 }
 0x2fa   :  { %1905 = vmatprep.subr.mxu0 %v993_v39  ;;  %2084 = vmatprep.subr.mxu1 %v1009_v45 }
 0x2fb   :  { %1906 = vmatpush3.msra.mxu0 %v977_v40  ;;  %2085 = vmatpush3.msra.mxu1 %v1009_v45 }
 0x2fc   :  { %1907 = vmatprep.subr.mxu0 %v992_v41  ;;  %2086 = vmatprep.subr.mxu1 %v1008_v48 }
 0x2fd   :  { %1908 = vmatpush3.msra.mxu0 %v976_v43  ;;  %2087 = vmatpush3.msra.mxu1 %v1008_v48 }
 0x2fe   :  { %1909 = vmatprep.subr.mxu0 %v991_v44  ;;  %2088 = vmatprep.subr.mxu1 %v1007_v52 }
 0x2ff   :  { %1910 = vmatpush3.msra.mxu0 %v975_v46  ;;  %2089 = vmatpush3.msra.mxu1 %v1007_v52 }
 0x300   :  { %1911 = vmatprep.subr.mxu0 %v990_v47  ;;  %2090 = vmatprep.subr.mxu1 %v1006_v55 }
 0x301   :  { %1912 = vmatpush3.msra.mxu0 %v974_v49  ;;  %2091 = vmatpush3.msra.mxu1 %v1006_v55 }
 0x302   :  { %1913 = vmatprep.subr.mxu0 %v989_v51  ;;  %2092 = vmatprep.subr.mxu1 %v1005_v58 }
 0x303   :  { %1914 = vmatpush3.msra.mxu0 %v973_v53  ;;  %2093 = vmatpush3.msra.mxu1 %v1005_v58 }
 0x304   :  { %1915 = vmatprep.subr.mxu0 %v988_v54  ;;  %2094 = vmatprep.subr.mxu1 %v1004_v60 }
 0x305   :  { %1916 = vmatpush3.msra.mxu0 %v972_v56  ;;  %2095 = vmatpush3.msra.mxu1 %v1004_v60 }
 0x306   :  { %1917 = vmatprep.subr.mxu0 %v987_v57  ;;  %2096 = vmatprep.subr.mxu1 %v1003_v61 }
 0x307   :  { %1918 = vmatpush3.msra.mxu0 %v971_v59  ;;  %2097 = vmatpush3.msra.mxu1 %v1003_v61 }
 0x3a0   :  { %v2042_v62 = vpop.f32.mrf.mxu0 }
 0x3a2   :  { %v748_v63 = vpop.f32.mrf.mxu0  ;;  %v2062_v0 = vpop.f32.mrf.mxu1 }
 0x3a4   :  { %v2045_v2 = vpop.f32.mrf.mxu0  ;;  %v952_v3 = vpop.f32.mrf.mxu1 }
 0x3a5   :  { %2098 = vmatprep.mubr.f32.mxu1 %v952_v3 }
 0x3a6   :  { %v758_v4 = vpop.f32.mrf.mxu0  ;;  %2099 = vmatmul.mubr.f32.vlgmr.msra.gmra.mxu1 %v2062_v0  ;;  %v2065_v5 = vpop.f32.mrf.mxu1 }
 0x3a8   :  { %v2052_v6 = vpop.f32.mrf.mxu0  ;;  %v962_v7 = vpop.f32.mrf.mxu1 }
 0x3a9   :  { %2101 = vmatprep.mubr.f32.mxu1 %v962_v7 }
 0x3aa   :  { %v850_v8 = vpop.f32.mrf.mxu0  ;;  %2102 = vmatmul.mubr.f32.gmra.mxu1 %v2065_v5 }
 0x3ab   :  { %1090 = vmatprep.mubr.f32.mxu0 %v850_v8  ;;  %2112 = vmatprep.mubr.msk.f32.mxu1 %vm78_vm1, %v1267_v12 }
 0x3ac   :  { %1091 = vmatmul.mubr.f32.vlgmr.msra.gmra.mxu0 %v748_v63  ;;  %v2055_v9 = vpop.f32.mrf.mxu0 }
 0x3ad   :  { %1095 = vmatprep.mubr.f32.mxu0 %v2052_v6 }
 0x3ae   :  { %v860_v10 = vpop.f32.mrf.mxu0 }
 0x3b0   :  { %1096 = vmatmul.mubr.f32.gmra.mxu0 %v2042_v62 }
 0x3b1   :  { %1100 = vmatprep.mubr.f32.mxu0 %v860_v10 }
 0x3b4   :  { %1101 = vmatmul.mubr.f32.gmra.mxu0 %v758_v4 }
 0x3b5   :  { %1105 = vmatprep.mubr.f32.mxu0 %v2055_v9 }
 0x3b8   :  { %1106 = vmatmul.mubr.f32.gmra.mxu0 %v2045_v2 }
 0x3b9   :  { %2126 = vmatprep.mubr.msk.f32.mxu0 %vm78_vm1, %v1778_v11 }
 0x466   :  { %v2100_v15 = vpop.f32.mrf.mxu1 }
 0x468   :  { %v1177_v20 = vpop.f32.mrf.mxu1 }
 0x46a   :  { %v2103_v25 = vpop.f32.mrf.mxu1 }
 0x46c   :  { %v1919_v13 = vpop.f32.mrf.mxu0  ;;  %v1187_v32 = vpop.f32.mrf.mxu1 }
 0x46e   :  { %v1920_v14 = vpop.f32.mrf.mxu0 }
 0x46f   :  { %v1921_v17 = vadd.f32 %v1920_v14, %v1919_v13  ;;  %v1236_v13 = vld [vmem:[%s2880_s13] sm:$0x1] }
 0x470   :  { %v1922_v16 = vpop.f32.mrf.mxu0 }
 0x471   :  { %v1093_v24 = vadd.f32 %v1921_v17, %v1773_v18 }
 0x472   :  { %v1923_v19 = vpop.f32.mrf.mxu0 }
 0x473   :  { %v1924_v21 = vadd.f32 %v1923_v19, %v1922_v16  ;;  %v1178_v30 = vadd.f32 %v1177_v20, %v1093_v24  ;;  %v1246_v16 = vld [vmem:[%s2881_s14] sm:$0x1] }
 0x474   :  { %v1925_v22 = vpop.f32.mrf.mxu0 }
 0x475   :  { %v1098_v23 = vadd.f32 %v1924_v21, %v1773_v18  ;;  %v1197_v37 = vsel %vm1196_vm4, %v1178_v30, 0.0 }
 0x476   :  { %v1926_v26 = vpop.f32.mrf.mxu0 }
 0x477   :  { %v1183_v27 = vadd.f32 %v2100_v15, %v1098_v23  ;;  %v1927_v28 = vadd.f32 %v1926_v26, %v1925_v22 }
 0x478   :  { %v1928_v29 = vpop.f32.mrf.mxu0 }
 0x479   :  { %v1103_v31 = vadd.f32 %v1927_v28, %v1773_v18  ;;  %v1198_v34 = vsel %vm1196_vm4, %v1183_v27, 0.0 }
 0x47a   :  { %v1929_v33 = vpop.f32.mrf.mxu0  ;;  %v1199_v40 = vadd.f32 %v1198_v34, %v1197_v37 }
 0x47b   :  { %v1188_v35 = vadd.f32 %v1187_v32, %v1103_v31  ;;  %v1930_v36 = vadd.f32 %v1929_v33, %v1928_v29 }
 0x47d   :  { %v1200_v38 = vsel %vm1196_vm4, %v1188_v35, 0.0  ;;  %v1108_v39 = vadd.f32 %v1930_v36, %v1773_v18 }
 0x47e   :  { %v1201_v42 = vadd.f32 %v1200_v38, %v1199_v40  ;;  %v1780_v38 = vld [vmem:[%s2882_s15 + $0x30] sm:$0xff]  ;;  %v1781_v40 = vld [vmem:[%s2882_s15 + $0x38] sm:$0xff] }
 0x47f   :  { %v1193_v41 = vadd.f32 %v2103_v25, %v1108_v39  ;;  %v1269_v39 = vld [vmem:[%s2882_s15 + $0x10] sm:$0xff] }
 0x481   :  { %v1202_v43 = vsel %vm1196_vm4, %v1193_v41, 0.0 }
 0x482   :  { %v1203_v44 = vadd.f32 %v1202_v43, %v1201_v42  ;;  %v1786_v42 = vld [vmem:[%s2882_s15 + $0x40] sm:$0xff]  ;;  %v1787_v43 = vld [vmem:[%s2882_s15 + $0x48] sm:$0xff] }
 0x484   :  { %v1204_v45 = vrot.slane %v1203_v44, 4 }
 0x486   :  { %v1205_v46 = vadd.f32 %v1204_v45, %v1203_v44  ;;  %v1788_v44 = vld [vmem:[%s2882_s15 + $0x50] sm:$0xff]  ;;  %v1789_v45 = vld [vmem:[%s2882_s15 + $0x58] sm:$0xff] }
 0x488   :  { %v1206_v47 = vrot.slane %v1205_v46, 2 }
 0x48a   :  { %v1207_v48 = vadd.f32 %v1206_v47, %v1205_v46  ;;  %v1607_v46 = vld [vmem:[%s2883_s16 + $0x78] sm:$0xff]  ;;  %v1606_v47 = vld [vmem:[%s2883_s16 + $0x70] sm:$0xff] }
 0x48c   :  { %v1208_v49 = vrot.slane %v1207_v48, 1 }
 0x48e   :  { %v1209_v51 = vadd.f32 %v1208_v49, %v1207_v48  ;;  %v1605_v48 = vld [vmem:[%s2883_s16 + $0x68] sm:$0xff]  ;;  %v1604_v49 = vld [vmem:[%s2883_s16 + $0x60] sm:$0xff] }
 0x490   :  { %v1211_v52 = vmul.f32 0.03125, %v1209_v51  ;;  %v1603_v51 = vld [vmem:[%s2883_s16 + $0x58] sm:$0xff] }
 0x492   :  { %v1212_v53 = vsub.f32 %v1178_v30, %v1211_v52  ;;  %v1213_v54 = vsub.f32 %v1183_v27, %v1211_v52  ;;  %v1214_v55 = vsub.f32 %v1188_v35, %v1211_v52  ;;  %v1215_v56 = vsub.f32 %v1193_v41, %v1211_v52 }
 0x494   :  { %v1216_v57 = vmul.f32 %v1212_v53, %v1212_v53  ;;  %v1217_v58 = vmul.f32 %v1213_v54, %v1213_v54  ;;  %v1218_v59 = vmul.f32 %v1214_v55, %v1214_v55  ;;  %v1219_v60 = vmul.f32 %v1215_v56, %v1215_v56  ;;  %v1601_v53 = vld [vmem:[%s2883_s16 + $0x48] sm:$0xff]  ;;  %v1600_v54 = vld [vmem:[%s2883_s16 + $0x40] sm:$0xff]  ;;  %v1599_v55 = vld [vmem:[%s2883_s16 + $0x38] sm:$0xff] }
 0x495   :  { %v1598_v56 = vld [vmem:[%s2883_s16 + $0x30] sm:$0xff] }
 0x496   :  { %v1220_v61 = vsel %vm1196_vm4, %v1216_v57, 0.0  ;;  %v1221_v62 = vsel %vm1196_vm4, %v1217_v58, 0.0  ;;  %v1223_v0 = vsel %vm1196_vm4, %v1218_v59, 0.0  ;;  %v1225_v3 = vsel %vm1196_vm4, %v1219_v60, 0.0  ;;  %v1597_v57 = vld [vmem:[%s2883_s16 + $0x28] sm:$0xff]  ;;  %v1596_v58 = vld [vmem:[%s2883_s16 + $0x20] sm:$0xff] }
 0x497   :  { %v1222_v63 = vadd.f32 %v1221_v62, %v1220_v61  ;;  %v1595_v59 = vld [vmem:[%s2883_s16 + $0x18] sm:$0xff]  ;;  %v1594_v60 = vld [vmem:[%s2883_s16 + $0x10] sm:$0xff]  ;;  %v1593_v61 = vld [vmem:[%s2883_s16 + $0x8] sm:$0xff] }
 0x498   :  { %v1592_v62 = vld [vmem:[%s2883_s16] sm:$0xff] }
 0x499   :  { %v1224_v2 = vadd.f32 %v1223_v0, %v1222_v63  ;;  %v1615_v63 = vld [vmem:[%s2883_s16 + $0xb8] sm:$0xff]  ;;  %v1614_v0 = vld [vmem:[%s2883_s16 + $0xb0] sm:$0xff] }
 0x49b   :  { %v1226_v4 = vadd.f32 %v1225_v3, %v1224_v2  ;;  %v1613_v2 = vld [vmem:[%s2883_s16 + $0xa8] sm:$0xff]  ;;  %v1612_v3 = vld [vmem:[%s2883_s16 + $0xa0] sm:$0xff] }
 0x49d   :  { %v1227_v5 = vrot.slane %v1226_v4, 4 }
 0x49f   :  { %v1228_v6 = vadd.f32 %v1227_v5, %v1226_v4  ;;  %v1611_v4 = vld [vmem:[%s2883_s16 + $0x98] sm:$0xff]  ;;  %v1610_v5 = vld [vmem:[%s2883_s16 + $0x90] sm:$0xff] }
 0x4a1   :  { %v1229_v7 = vrot.slane %v1228_v6, 2 }
 0x4a3   :  { %v1230_v8 = vadd.f32 %v1229_v7, %v1228_v6  ;;  %v1609_v6 = vld [vmem:[%s2883_s16 + $0x88] sm:$0xff]  ;;  %v1608_v7 = vld [vmem:[%s2883_s16 + $0x80] sm:$0xff] }
 0x4a5   :  { %v1231_v9 = vrot.slane %v1230_v8, 1 }
 0x4a7   :  { %v1232_v10 = vadd.f32 %v1231_v9, %v1230_v8 }
 0x4a9   :  { %v1233_v11 = vmul.f32 0.03125, %v1232_v10 }
 0x4ab   :  { %v1234_v12 = vadd.f32 1e-05, %v1233_v11 }
 0x4ad   :  { %2152 = vrsqrt.f32 %v1234_v12 }
 0x4ba   :  { %v2153_v14 = vpop.eup %2152 }
 0x4bb   :  { %v1237_v15 = vmul.f32 %v2153_v14, %v1236_v13 }
 0x4bd   :  { %v1241_v17 = vrot.slane %v1237_v15, %v2490_v50  ;;  %v1247_v18 = vmul.f32 %v1237_v15, %v1211_v52  ;;  %v1602_v52 = vld [vmem:[%s2883_s16 + $0x50] sm:$0xff] }
 0x4bf   :  { %v1248_v19 = vsub.f32 %v1246_v16, %v1247_v18  ;;  %v1245_v20 = vmul.f32 %v1241_v17, %v1193_v41  ;;  %v1244_v22 = vmul.f32 %v1241_v17, %v1188_v35  ;;  %v1243_v23 = vmul.f32 %v1241_v17, %v1183_v27  ;;  %v1268_v35 = vld [vmem:[%s2882_s15 + $0x8] sm:$0xff]  ;;  %v1270_v41 = vld [vmem:[%s2882_s15 + $0x18] sm:$0xff] }
 0x4c0   :  { %v1242_v28 = vmul.f32 %v1241_v17, %v1178_v30  ;;  %v1779_v30 = vld [vmem:[%s2882_s15 + $0x28] sm:$0xff] }
 0x4c1   :  { %v1253_v21 = vrot.slane %v1248_v19, %v2490_v50 }
 0x4c3   :  { %v1258_v24 = vadd.f32 %v1253_v21, %v1245_v20  ;;  %v1257_v25 = vadd.f32 %v1253_v21, %v1244_v22  ;;  %v1256_v26 = vadd.f32 %v1253_v21, %v1243_v23  ;;  %v1255_v32 = vadd.f32 %v1253_v21, %v1242_v28  ;;  %v1794_v28 = vld [vmem:[%s2884_s17] ss:$0 sm:$0xff] }
 0x4c5   :  { %v1262_v29 = vmul.f32 0.2, %v1258_v24  ;;  %v1261_v31 = vmul.f32 0.2, %v1257_v25  ;;  %v1260_v34 = vmul.f32 0.2, %v1256_v26 }
 0x4c6   :  { %v1259_v37 = vmul.f32 0.2, %v1255_v32 }
 0x4c7   :  { %v1266_v33 = vmax.f32 %v1258_v24, %v1262_v29  ;;  %v1265_v36 = vmax.f32 %v1257_v25, %v1261_v31  ;;  %v1264_v50 = vmax.f32 %v1256_v26, %v1260_v34 }
 0x4c8   :  { %v1263_v27 = vmax.f32 %v1255_v32, %v1259_v37 }
 0x4c9   :  { %2104 = vmatprep.subr.mxu1 %v1266_v33  ;;  %2118 = vmatprep.subr.mxu0 %v1266_v33 }
 0x4ca   :  { %2105 = vmatpush3.msra.mxu1 %v1266_v33  ;;  %2119 = vmatpush3.msra.mxu0 %v1266_v33 }
 0x4cb   :  { %2106 = vmatprep.subr.mxu1 %v1265_v36  ;;  %2120 = vmatprep.subr.mxu0 %v1265_v36 }
 0x4cc   :  { %2107 = vmatpush3.msra.mxu1 %v1265_v36  ;;  %2121 = vmatpush3.msra.mxu0 %v1265_v36 }
 0x4cd   :  { %2108 = vmatprep.subr.mxu1 %v1264_v50  ;;  %2122 = vmatprep.subr.mxu0 %v1264_v50 }
 0x4ce   :  { %2109 = vmatpush3.msra.mxu1 %v1264_v50  ;;  %2123 = vmatpush3.msra.mxu0 %v1264_v50 }
 0x4cf   :  { %2110 = vmatprep.subr.mxu1 %v1263_v27  ;;  %2124 = vmatprep.subr.mxu0 %v1263_v27 }
 0x4d0   :  { %2111 = vmatpush3.msra.mxu1 %v1263_v27  ;;  %2125 = vmatpush3.msra.mxu0 %v1263_v27 }
 0x4d1   :  { %2127 = vmatmul.mubr.msk.f32.vlgmr.msra.gmra.mxu0 %vm78_vm1, %v1779_v30  ;;  %2132 = vmatprep.subr.mxu1 %v1266_v33 }
 0x4d2   :  { %2113 = vmatmul.mubr.msk.f32.vlgmr.msra.gmra.mxu1 %vm78_vm1, %v1268_v35  ;;  %2129 = vmatprep.mubr.msk.f32.mxu0 %vm78_vm1, %v1780_v38 }
 0x4d3   :  { %2133 = vmatpush3.msra.mxu1 %v1266_v33  ;;  %2115 = vmatprep.mubr.msk.f32.mxu1 %vm78_vm1, %v1269_v39 }
 0x4d4   :  { %2134 = vmatprep.subr.mxu1 %v1265_v36  ;;  %1635 = vmatprep.subr.mxu0 %v2177_v1 }
 0x4d5   :  { %2135 = vmatpush3.msra.mxu1 %v1265_v36  ;;  %2130 = vmatmul.mubr.msk.f32.gmra.mxu0 %vm78_vm1, %v1781_v40 }
 0x4d6   :  { %2136 = vmatprep.subr.mxu1 %v1264_v50  ;;  %2116 = vmatmul.mubr.msk.f32.gmra.mxu1 %vm78_vm1, %v1270_v41 }
 0x4d7   :  { %2137 = vmatpush3.msra.mxu1 %v1264_v50  ;;  %2140 = vmatprep.mubr.msk.f32.mxu1 %vm78_vm1, %v1786_v42 }
 0x4d8   :  { %2138 = vmatprep.subr.mxu1 %v1263_v27  ;;  %1636 = vmatpush1.msra.mxu0 %v1607_v46 }
 0x4d9   :  { %2139 = vmatpush3.msra.mxu1 %v1263_v27  ;;  %1637 = vmatprep.subr.mxu0 %v2177_v1 }
 0x4da   :  { %2141 = vmatmul.mubr.msk.f32.vlgmr.msra.gmra.mxu1 %vm78_vm1, %v1787_v43  ;;  %1638 = vmatpush1.msra.mxu0 %v1606_v47 }
 0x4db   :  { %2143 = vmatprep.mubr.msk.f32.mxu1 %vm78_vm1, %v1788_v44  ;;  %1639 = vmatprep.subr.mxu0 %v2177_v1 }
 0x4dc   :  { %1640 = vmatpush1.msra.mxu0 %v1605_v48 }
 0x4dd   :  { %1641 = vmatprep.subr.mxu0 %v2177_v1 }
 0x4de   :  { %2144 = vmatmul.mubr.msk.f32.gmra.mxu1 %vm78_vm1, %v1789_v45  ;;  %1642 = vmatpush1.msra.mxu0 %v1604_v49 }
 0x4df   :  { %1643 = vmatprep.subr.mxu0 %v2177_v1 }
 0x4e0   :  { %1644 = vmatpush1.msra.mxu0 %v1603_v51 }
 0x4e1   :  { %1645 = vmatprep.subr.mxu0 %v2177_v1 }
 0x4e2   :  { %1646 = vmatpush1.msra.mxu0 %v1602_v52 }
 0x4e3   :  { %1647 = vmatprep.subr.mxu0 %v2177_v1 }
 0x4e4   :  { %1648 = vmatpush1.msra.mxu0 %v1601_v53 }
 0x4e5   :  { %1649 = vmatprep.subr.mxu0 %v2177_v1 }
 0x4e6   :  { %1650 = vmatpush1.msra.mxu0 %v1600_v54 }
 0x4e7   :  { %1651 = vmatprep.subr.mxu0 %v2177_v1 }
 0x4e8   :  { %1652 = vmatpush1.msra.mxu0 %v1599_v55 }
 0x4e9   :  { %1653 = vmatprep.subr.mxu0 %v2177_v1 }
 0x4ea   :  { %1654 = vmatpush1.msra.mxu0 %v1598_v56 }
 0x4eb   :  { %1655 = vmatprep.subr.mxu0 %v2177_v1 }
 0x4ec   :  { %1656 = vmatpush1.msra.mxu0 %v1597_v57 }
 0x4ed   :  { %1657 = vmatprep.subr.mxu0 %v2177_v1 }
 0x4ee   :  { %1658 = vmatpush1.msra.mxu0 %v1596_v58 }
 0x4ef   :  { %1659 = vmatprep.subr.mxu0 %v2177_v1 }
 0x4f0   :  { %1660 = vmatpush1.msra.mxu0 %v1595_v59 }
 0x4f1   :  { %1661 = vmatprep.subr.mxu0 %v2177_v1 }
 0x4f2   :  { %1662 = vmatpush1.msra.mxu0 %v1594_v60 }
 0x4f3   :  { %1663 = vmatprep.subr.mxu0 %v2177_v1 }
 0x4f4   :  { %1664 = vmatpush1.msra.mxu0 %v1593_v61 }
 0x4f5   :  { %1665 = vmatprep.subr.mxu0 %v2177_v1 }
 0x4f6   :  { %1666 = vmatpush1.msra.mxu0 %v1592_v62 }
 0x4f7   :  { %1683 = vmatprep.subr.mxu0 %v2177_v1 }
 0x4f8   :  { %1684 = vmatpush2.msra.mxu0 %v1615_v63 }
 0x4f9   :  { %1685 = vmatprep.subr.mxu0 %v2177_v1 }
 0x4fa   :  { %1686 = vmatpush2.msra.mxu0 %v1614_v0 }
 0x4fb   :  { %1687 = vmatprep.subr.mxu0 %v2177_v1 }
 0x4fc   :  { %1688 = vmatpush2.msra.mxu0 %v1613_v2 }
 0x4fd   :  { %1689 = vmatprep.subr.mxu0 %v2177_v1 }
 0x4fe   :  { %1690 = vmatpush2.msra.mxu0 %v1612_v3 }
 0x4ff   :  { %1691 = vmatprep.subr.mxu0 %v2177_v1 }
 0x500   :  { %1692 = vmatpush2.msra.mxu0 %v1611_v4 }
 0x501   :  { %1693 = vmatprep.subr.mxu0 %v2177_v1 }
 0x502   :  { %1694 = vmatpush2.msra.mxu0 %v1610_v5 }
 0x503   :  { %1695 = vmatprep.subr.mxu0 %v2177_v1 }
 0x504   :  { %1696 = vmatpush2.msra.mxu0 %v1609_v6 }
 0x505   :  { %1697 = vmatprep.subr.mxu0 %v2177_v1 }
 0x506   :  { %1698 = vmatpush2.msra.mxu0 %v1608_v7 }
 0x591   :  { %v2128_v8 = vpop.f32.mrf.mxu0 }
 0x592   :  { %v2114_v9 = vpop.f32.mrf.mxu1 }
 0x593   :  { %v1451_v10 = vpop.f32.mrf.mxu0 }
 0x594   :  { %1576 = vrot.lane.b32.xlu0 %v1451_v10, %s2179_s10  ;;  %v1349_v11 = vpop.f32.mrf.mxu1 }
 0x595   :  { %v2131_v12 = vpop.f32.mrf.mxu0 }
 0x596   :  { %v2117_v13 = vpop.f32.mrf.mxu1 }
 0x597   :  { %v1461_v14 = vpop.f32.mrf.mxu0 }
 0x598   :  { %1578 = vrot.lane.b32.xlu0 %v2128_v8, %s2179_s10  ;;  %1580 = vrot.lane.b32.xlu1 %v1461_v14, %s2179_s10  ;;  %v1359_v15 = vpop.f32.mrf.mxu1 }
 0x59a   :  { %v2142_v16 = vpop.f32.mrf.mxu1 }
 0x59c   :  { %1582 = vrot.lane.b32.xlu1 %v2131_v12, %s2179_s10  ;;  %v1553_v1 = vpop.f32.mrf.mxu1 }
 0x59d   :  { %1795 = vmatprep.mubr.msk.f32.mxu0 %vm1196_vm4, %v1553_v1 }
 0x59e   :  { %v2145_v17 = vpop.f32.mrf.mxu1 }
 0x5a0   :  { %v1563_v20 = vpop.f32.mrf.mxu1 }
 0x606   :  { %v1577_v18 = vpop.permute.xlu0 %1576 }
 0x607   :  { %v1588_v19 = vsel %vm1196_vm4, %v1349_v11, %v1577_v18 }
 0x608   :  { %1700 = vmatmul.mubr.f32.vlgmr.msra.gmra.mxu0 %v1588_v19 }
 0x609   :  { %1796 = vmatprep.mubr.msk.f32.mxu0 %vm1196_vm4, %v2142_v16 }
 0x60a   :  { %v1579_v21 = vpop.permute.xlu0 %1578  ;;  %v1581_v22 = vpop.permute.xlu1 %1580 }
 0x60b   :  { %v1589_v23 = vsel %vm1196_vm4, %v2114_v9, %v1579_v21  ;;  %v1590_v24 = vsel %vm1196_vm4, %v1359_v15, %v1581_v22 }
 0x60c   :  { %1705 = vmatmul.mubr.f32.gmra.mxu0 %v1589_v23 }
 0x60d   :  { %1797 = vmatprep.mubr.msk.f32.mxu0 %vm1196_vm4, %v1563_v20 }
 0x60e   :  { %v1583_v25 = vpop.permute.xlu1 %1582 }
 0x60f   :  { %v1591_v26 = vsel %vm1196_vm4, %v2117_v13, %v1583_v25 }
 0x610   :  { %1710 = vmatmul.mubr.f32.gmra.mxu0 %v1590_v24 }
 0x611   :  { %1798 = vmatprep.mubr.msk.f32.mxu0 %vm1196_vm4, %v2145_v17 }
 0x614   :  { %1715 = vmatmul.mubr.f32.gmra.mxu0 %v1591_v26 }
 0x6c8   :  { %v1701_v29 = vpop.f32.mrf.mxu0 }
 0x6c9   :  { %v1702_v31 = vadd.f32 %v1794_v28, %v1701_v29 }
 0x6ca   :  { %v1703_v32 = vpop.f32.mrf.mxu0 }
 0x6cb   :  { %2154 = vtanh.f32 %v1702_v31 }
 0x6cc   :  { %v1706_v33 = vpop.f32.mrf.mxu0 }
 0x6cd   :  { %v1707_v34 = vadd.f32 %v1794_v28, %v1706_v33 }
 0x6ce   :  { %v1708_v36 = vpop.f32.mrf.mxu0 }
 0x6cf   :  { %2156 = vtanh.f32 %v1707_v34 }
 0x6d0   :  { %v1711_v37 = vpop.f32.mrf.mxu0 }
 0x6d1   :  { %v1712_v50 = vadd.f32 %v1794_v28, %v1711_v37 }
 0x6d2   :  { %v1713_v27 = vpop.f32.mrf.mxu0 }
 0x6d3   :  { %2158 = vtanh.f32 %v1712_v50 }
 0x6d4   :  { %v1716_v30 = vpop.f32.mrf.mxu0 }
 0x6d5   :  { %v1717_v35 = vadd.f32 %v1794_v28, %v1716_v30 }
 0x6d6   :  { %v1718_v38 = vpop.f32.mrf.mxu0 }
 0x6d7   :  { %2160 = vtanh.f32 %v1717_v35 }
 0x6d8   :  { %v2155_v39 = vpop.eup %2154 }
 0x6d9   :  { %1725 = vst.msk [vmem:[%s2885_s18] sm:$0xff] %vm1724_vm5, %v2155_v39 }
 0x6dc   :  { %v2157_v40 = vpop.eup %2156 }
 0x6dd   :  { %1726 = vst.msk [vmem:[%s2885_s18 + $0x8] sm:$0xff] %vm1724_vm5, %v2157_v40 }
 0x6e0   :  { %v2159_v41 = vpop.eup %2158 }
 0x6e1   :  { %1727 = vst.msk [vmem:[%s2885_s18 + $0x10] sm:$0xff] %vm1724_vm5, %v2159_v41 }
 0x6e4   :  { %v2161_v42 = vpop.eup %2160 }
 0x6e5   :  { %1728 = vst.msk [vmem:[%s2885_s18 + $0x18] sm:$0xff] %vm1724_vm5, %v2161_v42 }
 0x6e6   :  { %1733 = vsyncpa [#allocation3], 1 }

</bundles_post_ra>
